<compile_context>
chip_gen: v7x
topology: tpu7x:2x2x1
jax: 0.10.0
libtpu: 0.0.40
codegen_flags: <defaults>
</compile_context>

<pallas_src>
import math

import jax
import jax.numpy as jnp
from jax.experimental import pallas as pl
from jax.experimental.pallas import tpu as pltpu  # noqa: F401  (imported per convention)

# --- model config (small, consistent with the module's forward) ---
N_EMBD = 32
N_HEAD = 4
N_LAYER = 2
VOCAB = 50
MAX_LEN = 64
BLOCK_SIZE = 8     # tril buffer size in the PyTorch module (>= T)
B = 2
T = 8
HEAD = N_EMBD // N_HEAD
EPS = 1e-5         # PyTorch LayerNorm default

VOCAB_PAD = 56                      # token rows padded to a sublane multiple
EMB_ROWS = VOCAB_PAD + T            # 64: [tok(50) | pad(6) | pos(8)]
LOGIT_PAD = 128                     # vocab head padded to a full 128-lane vreg
N_BIAS_ROWS = 6 * N_LAYER + N_LAYER + 1   # 15 packed bias/gain rows

assert T & (T - 1) == 0, "mask / pos-index construction uses power-of-two bit tricks"


def _layernorm(h, g, b):
    mu = jnp.mean(h, axis=-1, keepdims=True)
    var = jnp.mean((h - mu) ** 2, axis=-1, keepdims=True)
    return (h - mu) * jax.lax.rsqrt(var + EPS) * g + b


# ---------------- single fused kernel: embedding + all layers + final LN + head ----------------
def fused_decoder_kernel(ids_ref, emb_ref, bias_ref,
                         wqkv_ref, wp_ref, w1_ref, w2_ref, wh_ref,
                         logits_ref, attn_ref):
    cdt = wqkv_ref.dtype   # matmul operand dtype (bf16 on v6e/v7x, f32 elsewhere)

    # ---- fused embedding: tok[ids] + pos[t] as ONE one-hot matmul ----
    ids = ids_ref[...]                                                  # (B*T, 1) int32
    lane = jax.lax.broadcasted_iota(jnp.int32, (B * T, EMB_ROWS), 1)
    row = jax.lax.broadcasted_iota(jnp.int32, (B * T, EMB_ROWS), 0)
    pos_col = VOCAB_PAD + jnp.bitwise_and(row, T - 1)                   # 56 + (row % T)
    sel = (lane == ids) | (lane == pos_col)                             # selects tok row AND pos row
    x = jnp.dot(sel.astype(jnp.float32), emb_ref[...],
                preferred_element_type=jnp.float32)                     # (B*T, C)

    # ---- block-diagonal causal mask over flattened (b*T + t) rows/cols ----
    # same sequence block (b == b') AND causal (t >= t'); cross-batch scores get
    # -1e30 -> exp underflows to exactly 0, so per-row softmax equals per-batch softmax.
    r = jax.lax.broadcasted_iota(jnp.int32, (B * T, B * T), 0)
    c = jax.lax.broadcasted_iota(jnp.int32, (B * T, B * T), 1)
    same_seq = jnp.bitwise_and(r, -T) == jnp.bitwise_and(c, -T)
    mask = same_seq & (r >= c)
    scale = 1.0 / math.sqrt(HEAD)

    for l in range(N_LAYER):                                            # static unroll (2)
        # packed per-layer gains / biases (static slices of one resident array)
        ln1_g = bias_ref[6 * l + 0:6 * l + 1, :N_EMBD]
        ln1_b = bias_ref[6 * l + 1:6 * l + 2, :N_EMBD]
        bp    = bias_ref[6 * l + 2:6 * l + 3, :N_EMBD]
        ln2_g = bias_ref[6 * l + 3:6 * l + 4, :N_EMBD]
        ln2_b = bias_ref[6 * l + 4:6 * l + 5, :N_EMBD]
        b2    = bias_ref[6 * l + 5:6 * l + 6, :N_EMBD]
        b1    = bias_ref[6 * N_LAYER + l:6 * N_LAYER + l + 1, :]        # (1, 4C)

        # ---- multi-head causal self-attention (pre-LN) ----
        h = _layernorm(x, ln1_g, ln1_b)
        qkv = jnp.dot(h.astype(cdt), wqkv_ref[l],
                      preferred_element_type=jnp.float32)               # (B*T, 3C)

        head_outs = []
        for hd in range(N_HEAD):                                        # static unroll (4)
            qh = qkv[:, hd * HEAD:(hd + 1) * HEAD]                      # (B*T, hs)
            kh = qkv[:, N_EMBD + hd * HEAD:N_EMBD + (hd + 1) * HEAD]
            vh = qkv[:, 2 * N_EMBD + hd * HEAD:2 * N_EMBD + (hd + 1) * HEAD]

            # pure 2-D matmuls: batch folded into the row axis, masked block-diagonally
            s = jnp.dot(qh, kh.T, preferred_element_type=jnp.float32) * scale   # (B*T, B*T)
            s = jnp.where(mask, s, -1e30)
            s = s - jnp.max(s, axis=-1, keepdims=True)
            p = jnp.exp(s)
            wei = p / jnp.sum(p, axis=-1, keepdims=True)                # exact softmax

            # store maps directly in (L, B, H, T, T) layout -> zero wrapper transposes
            for bb in range(B):
                attn_ref[l, bb, hd] = wei[bb * T:(bb + 1) * T, bb * T:(bb + 1) * T]

            head_outs.append(jnp.dot(wei, vh, preferred_element_type=jnp.float32))

        cat = jnp.concatenate(head_outs, axis=-1)                       # (B*T, C)
        x = x + jnp.dot(cat.astype(cdt), wp_ref[l],
                        preferred_element_type=jnp.float32) + bp        # residual 1

        # ---- MLP (pre-LN) ----
        h2 = _layernorm(x, ln2_g, ln2_b)
        ff = jnp.dot(h2.astype(cdt), w1_ref[l], preferred_element_type=jnp.float32) + b1
        ff = jnp.maximum(ff, 0.0)                                       # ReLU
        x = x + jnp.dot(ff.astype(cdt), w2_ref[l],
                        preferred_element_type=jnp.float32) + b2        # residual 2

    # ---- final LayerNorm (affine folded into head) + 128-lane-padded vocab head ----
    mu = jnp.mean(x, axis=-1, keepdims=True)
    var = jnp.mean((x - mu) ** 2, axis=-1, keepdims=True)
    xn = (x - mu) * jax.lax.rsqrt(var + EPS)
    logits_ref[...] = (jnp.dot(xn.astype(cdt), wh_ref[...],
                               preferred_element_type=jnp.float32)
                       + bias_ref[6 * N_LAYER + N_LAYER:, :])           # (B*T, 128) lane-dense store


# ---------------- wrapper ----------------
def forward(ids, pp):
    """ids: (B, T) int32 token ids; pp: packed params. Returns (logits, None, attn_maps)."""
    logits_flat, attn = pl.pallas_call(
        fused_decoder_kernel,
        out_shape=(
            jax.ShapeDtypeStruct((B * T, LOGIT_PAD), jnp.float32),
            jax.ShapeDtypeStruct((N_LAYER, B, N_HEAD, T, T), jnp.float32),
        ),
    )(ids.reshape(B * T, 1), pp['emb'], pp['bias'],
      pp['wqkv'], pp['wp'], pp['w1'], pp['w2'], pp['wh'])

    logits = logits_flat[:, :VOCAB].reshape(B, T, VOCAB)    # drop pad lanes (metadata-only)
    attn_all = [attn[l] for l in range(N_LAYER)]            # already (B, H, T, T); no transposes
    return logits, None, attn_all


# ---------------- parameter packing (one-time, wrapper-side transforms) ----------------
def prepare_params(p, use_bf16):
    wdt = jnp.bfloat16 if use_bf16 else jnp.float32
    C, V, L = N_EMBD, VOCAB, N_LAYER

    # embedding table: [tok (50) | pad (6) | pos[:T] (8)] -> (64, 32)
    emb = jnp.zeros((EMB_ROWS, C), jnp.float32)
    emb = emb.at[:V].set(p['tok'])
    emb = emb.at[VOCAB_PAD:VOCAB_PAD + T].set(p['pos'][:T])

    # packed gains/biases -> (15, 128) f32: per layer 6 C-wide rows, then b1 rows, then folded bh
    bias = jnp.zeros((N_BIAS_ROWS, LOGIT_PAD), jnp.float32)
    for l in range(L):
        rows = jnp.stack([p['ln1_g'][l, 0], p['ln1_b'][l, 0], p['bp'][l, 0],
                          p['ln2_g'][l, 0], p['ln2_b'][l, 0], p['b2'][l, 0]], axis=0)
        bias = bias.at[6 * l:6 * l + 6, :C].set(rows)
        bias = bias.at[6 * L + l, :].set(p['b1'][l, 0])

    # fold final-LN affine into the vocab head, pad head to 128 lanes
    wh_fold = p['lnf_g'][0][:, None] * p['wh']                  # (C, V)
    bh_fold = p['lnf_b'][0] @ p['wh'] + p['bh'][0]              # (V,)
    bias = bias.at[6 * L + L, :V].set(bh_fold)
    wh_pad = jnp.zeros((C, LOGIT_PAD), jnp.float32).at[:, :V].set(wh_fold)

    return dict(
        emb=emb, bias=bias,
        wqkv=p['wqkv'].astype(wdt), wp=p['wp'].astype(wdt),
        w1=p['w1'].astype(wdt), w2=p['w2'].astype(wdt),
        wh=wh_pad.astype(wdt),
    )


# ---------------- parameters (deterministic, synthetic) ----------------
def make_params(key):
    def rnd(k, shape, scale=0.1):
        return jax.random.normal(k, shape, jnp.float32) * scale

    ks = jax.random.split(key, 17)
    L, C, V, H4 = N_LAYER, N_EMBD, VOCAB, 4 * N_EMBD
    return dict(
        tok=rnd(ks[0], (V, C), 1.0),
        pos=rnd(ks[1], (MAX_LEN, C), 1.0),
        ln1_g=1.0 + rnd(ks[2], (L, 1, C), 0.05),
        ln1_b=rnd(ks[3], (L, 1, C), 0.05),
        wqkv=rnd(ks[4], (L, C, 3 * C)),          # [Wq | Wk | Wv], each (C, C), head-major cols
        wp=rnd(ks[5], (L, C, C)),                # head-concat -> C projection
        bp=rnd(ks[6], (L, 1, C)),
        ln2_g=1.0 + rnd(ks[7], (L, 1, C), 0.05),
        ln2_b=rnd(ks[8], (L, 1, C), 0.05),
        w1=rnd(ks[9], (L, C, H4)),
        b1=rnd(ks[10], (L, 1, H4)),
        w2=rnd(ks[11], (L, H4, C)),
        b2=rnd(ks[12], (L, 1, C)),
        lnf_g=1.0 + rnd(ks[13], (1, C), 0.05),
        lnf_b=rnd(ks[14], (1, C), 0.05),
        wh=rnd(ks[15], (C, V)),                  # final Linear(n_embd, vocab)
        bh=rnd(ks[16], (1, V)),
    )


# ---------------- pure-JAX reference for verification (uses the raw params) ----------------
def ref_forward(ids, p):
    def ln(h, g, b):
        mu = jnp.mean(h, axis=-1, keepdims=True)
        var = jnp.mean((h - mu) ** 2, axis=-1, keepdims=True)
        return (h - mu) * jax.lax.rsqrt(var + EPS) * g + b

    x = p['tok'][ids] + p['pos'][:T][None, :, :]
    tril = jnp.tril(jnp.ones((T, T), jnp.float32))
    attn_all = []
    for l in range(N_LAYER):
        h = ln(x, p['ln1_g'][l, 0], p['ln1_b'][l, 0])
        qkv = h @ p['wqkv'][l]                                        # (B, T, 3C)
        outs, weis = [], []
        for hd in range(N_HEAD):
            q = qkv[..., hd * HEAD:(hd + 1) * HEAD]
            k = qkv[..., N_EMBD + hd * HEAD:N_EMBD + (hd + 1) * HEAD]
            v = qkv[..., 2 * N_EMBD + hd * HEAD:2 * N_EMBD + (hd + 1) * HEAD]
            wei = (q @ jnp.swapaxes(k, -1, -2)) * (HEAD ** -0.5)
            wei = jnp.where(tril == 0, -jnp.inf, wei)                 # causal mask
            wei = jax.nn.softmax(wei, axis=-1)
            weis.append(wei)
            outs.append(wei @ v)
        cat = jnp.concatenate(outs, axis=-1)
        x = x + (cat @ p['wp'][l] + p['bp'][l, 0])
        h2 = ln(x, p['ln2_g'][l, 0], p['ln2_b'][l, 0])
        ff = jnp.maximum(h2 @ p['w1'][l] + p['b1'][l, 0], 0.0) @ p['w2'][l] + p['b2'][l, 0]
        x = x + ff
        attn_all.append(jnp.stack(weis, axis=1))                      # (B, H, T, T)
    x = ln(x, p['lnf_g'][0], p['lnf_b'][0])
    logits = x @ p['wh'] + p['bh'][0]
    return logits, attn_all


if __name__ == "__main__":
    key = jax.random.PRNGKey(0)
    key, k_ids, k_params = jax.random.split(key, 3)
    ids = jax.random.randint(k_ids, (B, T), 0, VOCAB, dtype=jnp.int32)
    params = make_params(k_params)

    # bf16 MXU operands only where the review recommends it (v6e / v7x); f32 elsewhere.
    kind = jax.devices()[0].device_kind.lower()
    use_bf16 = ("v6" in kind) or ("v7" in kind)
    packed = prepare_params(params, use_bf16)

    fwd = jax.jit(forward)
    logits, loss, attn_all = fwd(ids, packed)
    logits = jax.block_until_ready(logits)
    attn_all = [jax.block_until_ready(a) for a in attn_all]

    # sanity check against a pure-JAX reference (raw, unpacked params)
    logits_ref, attn_ref_all = ref_forward(ids, params)
    assert jnp.allclose(logits, logits_ref, rtol=1e-2, atol=1e-2), \
        float(jnp.max(jnp.abs(logits - logits_ref)))
    for a, ar in zip(attn_all, attn_ref_all):
        assert jnp.allclose(a, ar, rtol=1e-2, atol=1e-2)
    assert loss is None

    print("KERNEL_OK")
</pallas_src>

<mosaic_0001>
module attributes {stable_mosaic.version = 11 : i64} {
  func.func @fused_decoder_kernel(%arg0: memref<16x1xi32, #tpu.memory_space<vmem>>, %arg1: memref<64x32xf32, #tpu.memory_space<vmem>>, %arg2: memref<15x128xf32, #tpu.memory_space<vmem>>, %arg3: memref<2x32x96xf32, #tpu.memory_space<vmem>>, %arg4: memref<2x32x32xf32, #tpu.memory_space<vmem>>, %arg5: memref<2x32x128xf32, #tpu.memory_space<vmem>>, %arg6: memref<2x128x32xf32, #tpu.memory_space<vmem>>, %arg7: memref<32x128xf32, #tpu.memory_space<vmem>>, %arg8: memref<16x128xf32, #tpu.memory_space<vmem>>, %arg9: memref<2x2x4x8x8xf32, #tpu.memory_space<vmem>>) attributes {dimension_semantics = [], scalar_prefetch = 0 : i64, scratch_operands = 0 : i64, tpu.core_type = #tpu.core_type<tc>} {
    %c0 = arith.constant 0 : index
    %c0_0 = arith.constant 0 : index
    %0 = vector.load %arg0[%c0, %c0_0] : memref<16x1xi32, #tpu.memory_space<vmem>>, vector<16x1xi32>
    %1 = tpu.iota {dimensions = array<i32: 1>} : vector<16x64xi32>
    %2 = tpu.iota {dimensions = array<i32: 0>} : vector<16x64xi32>
    %c7_i32 = arith.constant 7 : i32
    %3 = vector.broadcast %c7_i32 : i32 to vector<16x64xi32>
    %4 = arith.andi %2, %3 : vector<16x64xi32>
    %c56_i32 = arith.constant 56 : i32
    %5 = vector.broadcast %c56_i32 : i32 to vector<16x64xi32>
    %6 = arith.addi %5, %4 : vector<16x64xi32>
    %7 = vector.broadcast %0 : vector<16x1xi32> to vector<16x64xi32>
    %8 = arith.cmpi eq, %1, %7 : vector<16x64xi32>
    %9 = arith.cmpi eq, %1, %6 : vector<16x64xi32>
    %10 = arith.ori %8, %9 : vector<16x64xi1>
    %11 = arith.extui %10 : vector<16x64xi1> to vector<16x64xi32>
    %12 = arith.sitofp %11 : vector<16x64xi32> to vector<16x64xf32>
    %c0_1 = arith.constant 0 : index
    %c0_2 = arith.constant 0 : index
    %13 = vector.load %arg1[%c0_1, %c0_2] : memref<64x32xf32, #tpu.memory_space<vmem>>, vector<64x32xf32>
    %cst = arith.constant dense<0.000000e+00> : vector<16x32xf32>
    %14 = tpu.matmul %12, %13, %cst {dimension_numbers = #tpu.dot_dimension_numbers<[1], [0], [0], [1], [0, 0, 1, 1], [], []>} : vector<16x64xf32>, vector<64x32xf32>, vector<16x32xf32> -> vector<16x32xf32>
    %15 = tpu.iota {dimensions = array<i32: 0>} : vector<16x16xi32>
    %16 = tpu.iota {dimensions = array<i32: 1>} : vector<16x16xi32>
    %c-8_i32 = arith.constant -8 : i32
    %17 = vector.broadcast %c-8_i32 : i32 to vector<16x16xi32>
    %18 = arith.andi %15, %17 : vector<16x16xi32>
    %c-8_i32_3 = arith.constant -8 : i32
    %19 = vector.broadcast %c-8_i32_3 : i32 to vector<16x16xi32>
    %20 = arith.andi %16, %19 : vector<16x16xi32>
    %21 = arith.cmpi eq, %18, %20 : vector<16x16xi32>
    %22 = arith.cmpi sge, %15, %16 : vector<16x16xi32>
    %23 = arith.andi %21, %22 : vector<16x16xi1>
    %c0_4 = arith.constant 0 : index
    %c0_5 = arith.constant 0 : index
    %24 = vector.load %arg2[%c0_4, %c0_5] : memref<15x128xf32, #tpu.memory_space<vmem>>, vector<1x32xf32>
    %c1 = arith.constant 1 : index
    %c0_6 = arith.constant 0 : index
    %25 = vector.load %arg2[%c1, %c0_6] : memref<15x128xf32, #tpu.memory_space<vmem>>, vector<1x32xf32>
    %c2 = arith.constant 2 : index
    %c0_7 = arith.constant 0 : index
    %26 = vector.load %arg2[%c2, %c0_7] : memref<15x128xf32, #tpu.memory_space<vmem>>, vector<1x32xf32>
    %c3 = arith.constant 3 : index
    %c0_8 = arith.constant 0 : index
    %27 = vector.load %arg2[%c3, %c0_8] : memref<15x128xf32, #tpu.memory_space<vmem>>, vector<1x32xf32>
    %c4 = arith.constant 4 : index
    %c0_9 = arith.constant 0 : index
    %28 = vector.load %arg2[%c4, %c0_9] : memref<15x128xf32, #tpu.memory_space<vmem>>, vector<1x32xf32>
    %c5 = arith.constant 5 : index
    %c0_10 = arith.constant 0 : index
    %29 = vector.load %arg2[%c5, %c0_10] : memref<15x128xf32, #tpu.memory_space<vmem>>, vector<1x32xf32>
    %c12 = arith.constant 12 : index
    %c0_11 = arith.constant 0 : index
    %30 = vector.load %arg2[%c12, %c0_11] : memref<15x128xf32, #tpu.memory_space<vmem>>, vector<1x128xf32>
    %cst_12 = arith.constant dense<0.000000e+00> : vector<16xf32>
    %31 = vector.multi_reduction <add>, %14, %cst_12 [1] : vector<16x32xf32> to vector<16xf32>
    %32 = vector.shape_cast %31 : vector<16xf32> to vector<16x1xf32>
    %cst_13 = arith.constant 3.200000e+01 : f32
    %33 = vector.broadcast %cst_13 : f32 to vector<16x1xf32>
    %34 = arith.divf %32, %33 : vector<16x1xf32>
    %35 = vector.broadcast %34 : vector<16x1xf32> to vector<16x32xf32>
    %36 = arith.subf %14, %35 : vector<16x32xf32>
    %37 = arith.mulf %36, %36 : vector<16x32xf32>
    %cst_14 = arith.constant dense<0.000000e+00> : vector<16xf32>
    %38 = vector.multi_reduction <add>, %37, %cst_14 [1] : vector<16x32xf32> to vector<16xf32>
    %39 = vector.shape_cast %38 : vector<16xf32> to vector<16x1xf32>
    %cst_15 = arith.constant 3.200000e+01 : f32
    %40 = vector.broadcast %cst_15 : f32 to vector<16x1xf32>
    %41 = arith.divf %39, %40 : vector<16x1xf32>
    %42 = vector.broadcast %34 : vector<16x1xf32> to vector<16x32xf32>
    %43 = arith.subf %14, %42 : vector<16x32xf32>
    %cst_16 = arith.constant 9.99999974E-6 : f32
    %44 = vector.broadcast %cst_16 : f32 to vector<16x1xf32>
    %45 = arith.addf %41, %44 : vector<16x1xf32>
    %46 = math.rsqrt %45 : vector<16x1xf32>
    %47 = vector.broadcast %46 : vector<16x1xf32> to vector<16x32xf32>
    %48 = arith.mulf %43, %47 : vector<16x32xf32>
    %49 = vector.broadcast %24 : vector<1x32xf32> to vector<16x32xf32>
    %50 = arith.mulf %48, %49 : vector<16x32xf32>
    %51 = vector.broadcast %25 : vector<1x32xf32> to vector<16x32xf32>
    %52 = arith.addf %50, %51 : vector<16x32xf32>
    %c0_17 = arith.constant 0 : index
    %c0_18 = arith.constant 0 : index
    %c0_19 = arith.constant 0 : index
    %53 = vector.load %arg3[%c0_17, %c0_18, %c0_19] : memref<2x32x96xf32, #tpu.memory_space<vmem>>, vector<1x32x96xf32>
    %54 = vector.shape_cast %53 : vector<1x32x96xf32> to vector<32x96xf32>
    %cst_20 = arith.constant dense<0.000000e+00> : vector<16x96xf32>
    %55 = tpu.matmul %52, %54, %cst_20 {dimension_numbers = #tpu.dot_dimension_numbers<[1], [0], [0], [1], [0, 0, 1, 1], [], []>} : vector<16x32xf32>, vector<32x96xf32>, vector<16x96xf32> -> vector<16x96xf32>
    %56 = vector.extract_strided_slice %55 {offsets = [0, 0], sizes = [16, 8], strides = [1, 1]} : vector<16x96xf32> to vector<16x8xf32>
    %57 = vector.extract_strided_slice %55 {offsets = [0, 32], sizes = [16, 8], strides = [1, 1]} : vector<16x96xf32> to vector<16x8xf32>
    %58 = vector.extract_strided_slice %55 {offsets = [0, 64], sizes = [16, 8], strides = [1, 1]} : vector<16x96xf32> to vector<16x8xf32>
    %59 = tpu.transpose %57, [1, 0] : vector<16x8xf32> -> vector<8x16xf32>
    %cst_21 = arith.constant dense<0.000000e+00> : vector<16x16xf32>
    %60 = tpu.matmul %56, %59, %cst_21 {dimension_numbers = #tpu.dot_dimension_numbers<[1], [0], [0], [1], [0, 0, 1, 1], [], []>} : vector<16x8xf32>, vector<8x16xf32>, vector<16x16xf32> -> vector<16x16xf32>
    %cst_22 = arith.constant 0.353553385 : f32
    %61 = vector.broadcast %cst_22 : f32 to vector<16x16xf32>
    %62 = arith.mulf %60, %61 : vector<16x16xf32>
    %cst_23 = arith.constant -1.000000e+30 : f32
    %63 = vector.broadcast %cst_23 : f32 to vector<16x16xf32>
    %64 = arith.select %23, %62, %63 : vector<16x16xi1>, vector<16x16xf32>
    %cst_24 = arith.constant dense<0xFF800000> : vector<16xf32>
    %65 = vector.multi_reduction <maximumf>, %64, %cst_24 [1] : vector<16x16xf32> to vector<16xf32>
    %66 = vector.shape_cast %65 : vector<16xf32> to vector<16x1xf32>
    %67 = vector.broadcast %66 : vector<16x1xf32> to vector<16x16xf32>
    %68 = arith.subf %64, %67 : vector<16x16xf32>
    %69 = math.exp %68 : vector<16x16xf32>
    %cst_25 = arith.constant dense<0.000000e+00> : vector<16xf32>
    %70 = vector.multi_reduction <add>, %69, %cst_25 [1] : vector<16x16xf32> to vector<16xf32>
    %71 = vector.shape_cast %70 : vector<16xf32> to vector<16x1xf32>
    %72 = vector.broadcast %71 : vector<16x1xf32> to vector<16x16xf32>
    %73 = arith.divf %69, %72 : vector<16x16xf32>
    %74 = vector.extract_strided_slice %73 {offsets = [0, 0], sizes = [8, 8], strides = [1, 1]} : vector<16x16xf32> to vector<8x8xf32>
    %c0_26 = arith.constant 0 : index
    %c0_27 = arith.constant 0 : index
    %c0_28 = arith.constant 0 : index
    %c0_29 = arith.constant 0 : index
    %c0_30 = arith.constant 0 : index
    %75 = vector.load %arg9[%c0_26, %c0_27, %c0_28, %c0_29, %c0_30] : memref<2x2x4x8x8xf32, #tpu.memory_space<vmem>>, vector<1x1x1x8x8xf32>
    %76 = vector.shape_cast %75 : vector<1x1x1x8x8xf32> to vector<8x8xf32>
    %77 = vector.shape_cast %74 : vector<8x8xf32> to vector<1x1x1x8x8xf32>
    tpu.vector_store %arg9[%c0_26, %c0_27, %c0_28, %c0_29, %c0_30], %77 {strides = array<i32>} : memref<2x2x4x8x8xf32, #tpu.memory_space<vmem>>, vector<1x1x1x8x8xf32>,
    %78 = vector.extract_strided_slice %73 {offsets = [8, 8], sizes = [8, 8], strides = [1, 1]} : vector<16x16xf32> to vector<8x8xf32>
    %c0_31 = arith.constant 0 : index
    %c1_32 = arith.constant 1 : index
    %c0_33 = arith.constant 0 : index
    %c0_34 = arith.constant 0 : index
    %c0_35 = arith.constant 0 : index
    %79 = vector.load %arg9[%c0_31, %c1_32, %c0_33, %c0_34, %c0_35] : memref<2x2x4x8x8xf32, #tpu.memory_space<vmem>>, vector<1x1x1x8x8xf32>
    %80 = vector.shape_cast %79 : vector<1x1x1x8x8xf32> to vector<8x8xf32>
    %81 = vector.shape_cast %78 : vector<8x8xf32> to vector<1x1x1x8x8xf32>
    tpu.vector_store %arg9[%c0_31, %c1_32, %c0_33, %c0_34, %c0_35], %81 {strides = array<i32>} : memref<2x2x4x8x8xf32, #tpu.memory_space<vmem>>, vector<1x1x1x8x8xf32>,
    %cst_36 = arith.constant dense<0.000000e+00> : vector<16x8xf32>
    %82 = tpu.matmul %73, %58, %cst_36 {dimension_numbers = #tpu.dot_dimension_numbers<[1], [0], [0], [1], [0, 0, 1, 1], [], []>} : vector<16x16xf32>, vector<16x8xf32>, vector<16x8xf32> -> vector<16x8xf32>
    %83 = vector.extract_strided_slice %55 {offsets = [0, 8], sizes = [16, 8], strides = [1, 1]} : vector<16x96xf32> to vector<16x8xf32>
    %84 = vector.extract_strided_slice %55 {offsets = [0, 40], sizes = [16, 8], strides = [1, 1]} : vector<16x96xf32> to vector<16x8xf32>
    %85 = vector.extract_strided_slice %55 {offsets = [0, 72], sizes = [16, 8], strides = [1, 1]} : vector<16x96xf32> to vector<16x8xf32>
    %86 = tpu.transpose %84, [1, 0] : vector<16x8xf32> -> vector<8x16xf32>
    %cst_37 = arith.constant dense<0.000000e+00> : vector<16x16xf32>
    %87 = tpu.matmul %83, %86, %cst_37 {dimension_numbers = #tpu.dot_dimension_numbers<[1], [0], [0], [1], [0, 0, 1, 1], [], []>} : vector<16x8xf32>, vector<8x16xf32>, vector<16x16xf32> -> vector<16x16xf32>
    %cst_38 = arith.constant 0.353553385 : f32
    %88 = vector.broadcast %cst_38 : f32 to vector<16x16xf32>
    %89 = arith.mulf %87, %88 : vector<16x16xf32>
    %cst_39 = arith.constant -1.000000e+30 : f32
    %90 = vector.broadcast %cst_39 : f32 to vector<16x16xf32>
    %91 = arith.select %23, %89, %90 : vector<16x16xi1>, vector<16x16xf32>
    %cst_40 = arith.constant dense<0xFF800000> : vector<16xf32>
    %92 = vector.multi_reduction <maximumf>, %91, %cst_40 [1] : vector<16x16xf32> to vector<16xf32>
    %93 = vector.shape_cast %92 : vector<16xf32> to vector<16x1xf32>
    %94 = vector.broadcast %93 : vector<16x1xf32> to vector<16x16xf32>
    %95 = arith.subf %91, %94 : vector<16x16xf32>
    %96 = math.exp %95 : vector<16x16xf32>
    %cst_41 = arith.constant dense<0.000000e+00> : vector<16xf32>
    %97 = vector.multi_reduction <add>, %96, %cst_41 [1] : vector<16x16xf32> to vector<16xf32>
    %98 = vector.shape_cast %97 : vector<16xf32> to vector<16x1xf32>
    %99 = vector.broadcast %98 : vector<16x1xf32> to vector<16x16xf32>
    %100 = arith.divf %96, %99 : vector<16x16xf32>
    %101 = vector.extract_strided_slice %100 {offsets = [0, 0], sizes = [8, 8], strides = [1, 1]} : vector<16x16xf32> to vector<8x8xf32>
    %c0_42 = arith.constant 0 : index
    %c0_43 = arith.constant 0 : index
    %c1_44 = arith.constant 1 : index
    %c0_45 = arith.constant 0 : index
    %c0_46 = arith.constant 0 : index
    %102 = vector.load %arg9[%c0_42, %c0_43, %c1_44, %c0_45, %c0_46] : memref<2x2x4x8x8xf32, #tpu.memory_space<vmem>>, vector<1x1x1x8x8xf32>
    %103 = vector.shape_cast %102 : vector<1x1x1x8x8xf32> to vector<8x8xf32>
    %104 = vector.shape_cast %101 : vector<8x8xf32> to vector<1x1x1x8x8xf32>
    tpu.vector_store %arg9[%c0_42, %c0_43, %c1_44, %c0_45, %c0_46], %104 {strides = array<i32>} : memref<2x2x4x8x8xf32, #tpu.memory_space<vmem>>, vector<1x1x1x8x8xf32>,
    %105 = vector.extract_strided_slice %100 {offsets = [8, 8], sizes = [8, 8], strides = [1, 1]} : vector<16x16xf32> to vector<8x8xf32>
    %c0_47 = arith.constant 0 : index
    %c1_48 = arith.constant 1 : index
    %c1_49 = arith.constant 1 : index
    %c0_50 = arith.constant 0 : index
    %c0_51 = arith.constant 0 : index
    %106 = vector.load %arg9[%c0_47, %c1_48, %c1_49, %c0_50, %c0_51] : memref<2x2x4x8x8xf32, #tpu.memory_space<vmem>>, vector<1x1x1x8x8xf32>
    %107 = vector.shape_cast %106 : vector<1x1x1x8x8xf32> to vector<8x8xf32>
    %108 = vector.shape_cast %105 : vector<8x8xf32> to vector<1x1x1x8x8xf32>
    tpu.vector_store %arg9[%c0_47, %c1_48, %c1_49, %c0_50, %c0_51], %108 {strides = array<i32>} : memref<2x2x4x8x8xf32, #tpu.memory_space<vmem>>, vector<1x1x1x8x8xf32>,
    %cst_52 = arith.constant dense<0.000000e+00> : vector<16x8xf32>
    %109 = tpu.matmul %100, %85, %cst_52 {dimension_numbers = #tpu.dot_dimension_numbers<[1], [0], [0], [1], [0, 0, 1, 1], [], []>} : vector<16x16xf32>, vector<16x8xf32>, vector<16x8xf32> -> vector<16x8xf32>
    %110 = vector.extract_strided_slice %55 {offsets = [0, 16], sizes = [16, 8], strides = [1, 1]} : vector<16x96xf32> to vector<16x8xf32>
    %111 = vector.extract_strided_slice %55 {offsets = [0, 48], sizes = [16, 8], strides = [1, 1]} : vector<16x96xf32> to vector<16x8xf32>
    %112 = vector.extract_strided_slice %55 {offsets = [0, 80], sizes = [16, 8], strides = [1, 1]} : vector<16x96xf32> to vector<16x8xf32>
    %113 = tpu.transpose %111, [1, 0] : vector<16x8xf32> -> vector<8x16xf32>
    %cst_53 = arith.constant dense<0.000000e+00> : vector<16x16xf32>
    %114 = tpu.matmul %110, %113, %cst_53 {dimension_numbers = #tpu.dot_dimension_numbers<[1], [0], [0], [1], [0, 0, 1, 1], [], []>} : vector<16x8xf32>, vector<8x16xf32>, vector<16x16xf32> -> vector<16x16xf32>
    %cst_54 = arith.constant 0.353553385 : f32
    %115 = vector.broadcast %cst_54 : f32 to vector<16x16xf32>
    %116 = arith.mulf %114, %115 : vector<16x16xf32>
    %cst_55 = arith.constant -1.000000e+30 : f32
    %117 = vector.broadcast %cst_55 : f32 to vector<16x16xf32>
    %118 = arith.select %23, %116, %117 : vector<16x16xi1>, vector<16x16xf32>
    %cst_56 = arith.constant dense<0xFF800000> : vector<16xf32>
    %119 = vector.multi_reduction <maximumf>, %118, %cst_56 [1] : vector<16x16xf32> to vector<16xf32>
    %120 = vector.shape_cast %119 : vector<16xf32> to vector<16x1xf32>
    %121 = vector.broadcast %120 : vector<16x1xf32> to vector<16x16xf32>
    %122 = arith.subf %118, %121 : vector<16x16xf32>
    %123 = math.exp %122 : vector<16x16xf32>
    %cst_57 = arith.constant dense<0.000000e+00> : vector<16xf32>
    %124 = vector.multi_reduction <add>, %123, %cst_57 [1] : vector<16x16xf32> to vector<16xf32>
    %125 = vector.shape_cast %124 : vector<16xf32> to vector<16x1xf32>
    %126 = vector.broadcast %125 : vector<16x1xf32> to vector<16x16xf32>
    %127 = arith.divf %123, %126 : vector<16x16xf32>
    %128 = vector.extract_strided_slice %127 {offsets = [0, 0], sizes = [8, 8], strides = [1, 1]} : vector<16x16xf32> to vector<8x8xf32>
    %c0_58 = arith.constant 0 : index
    %c0_59 = arith.constant 0 : index
    %c2_60 = arith.constant 2 : index
    %c0_61 = arith.constant 0 : index
    %c0_62 = arith.constant 0 : index
    %129 = vector.load %arg9[%c0_58, %c0_59, %c2_60, %c0_61, %c0_62] : memref<2x2x4x8x8xf32, #tpu.memory_space<vmem>>, vector<1x1x1x8x8xf32>
    %130 = vector.shape_cast %129 : vector<1x1x1x8x8xf32> to vector<8x8xf32>
    %131 = vector.shape_cast %128 : vector<8x8xf32> to vector<1x1x1x8x8xf32>
    tpu.vector_store %arg9[%c0_58, %c0_59, %c2_60, %c0_61, %c0_62], %131 {strides = array<i32>} : memref<2x2x4x8x8xf32, #tpu.memory_space<vmem>>, vector<1x1x1x8x8xf32>,
    %132 = vector.extract_strided_slice %127 {offsets = [8, 8], sizes = [8, 8], strides = [1, 1]} : vector<16x16xf32> to vector<8x8xf32>
    %c0_63 = arith.constant 0 : index
    %c1_64 = arith.constant 1 : index
    %c2_65 = arith.constant 2 : index
    %c0_66 = arith.constant 0 : index
    %c0_67 = arith.constant 0 : index
    %133 = vector.load %arg9[%c0_63, %c1_64, %c2_65, %c0_66, %c0_67] : memref<2x2x4x8x8xf32, #tpu.memory_space<vmem>>, vector<1x1x1x8x8xf32>
    %134 = vector.shape_cast %133 : vector<1x1x1x8x8xf32> to vector<8x8xf32>
    %135 = vector.shape_cast %132 : vector<8x8xf32> to vector<1x1x1x8x8xf32>
    tpu.vector_store %arg9[%c0_63, %c1_64, %c2_65, %c0_66, %c0_67], %135 {strides = array<i32>} : memref<2x2x4x8x8xf32, #tpu.memory_space<vmem>>, vector<1x1x1x8x8xf32>,
    %cst_68 = arith.constant dense<0.000000e+00> : vector<16x8xf32>
    %136 = tpu.matmul %127, %112, %cst_68 {dimension_numbers = #tpu.dot_dimension_numbers<[1], [0], [0], [1], [0, 0, 1, 1], [], []>} : vector<16x16xf32>, vector<16x8xf32>, vector<16x8xf32> -> vector<16x8xf32>
    %137 = vector.extract_strided_slice %55 {offsets = [0, 24], sizes = [16, 8], strides = [1, 1]} : vector<16x96xf32> to vector<16x8xf32>
    %138 = vector.extract_strided_slice %55 {offsets = [0, 56], sizes = [16, 8], strides = [1, 1]} : vector<16x96xf32> to vector<16x8xf32>
    %139 = vector.extract_strided_slice %55 {offsets = [0, 88], sizes = [16, 8], strides = [1, 1]} : vector<16x96xf32> to vector<16x8xf32>
    %140 = tpu.transpose %138, [1, 0] : vector<16x8xf32> -> vector<8x16xf32>
    %cst_69 = arith.constant dense<0.000000e+00> : vector<16x16xf32>
    %141 = tpu.matmul %137, %140, %cst_69 {dimension_numbers = #tpu.dot_dimension_numbers<[1], [0], [0], [1], [0, 0, 1, 1], [], []>} : vector<16x8xf32>, vector<8x16xf32>, vector<16x16xf32> -> vector<16x16xf32>
    %cst_70 = arith.constant 0.353553385 : f32
    %142 = vector.broadcast %cst_70 : f32 to vector<16x16xf32>
    %143 = arith.mulf %141, %142 : vector<16x16xf32>
    %cst_71 = arith.constant -1.000000e+30 : f32
    %144 = vector.broadcast %cst_71 : f32 to vector<16x16xf32>
    %145 = arith.select %23, %143, %144 : vector<16x16xi1>, vector<16x16xf32>
    %cst_72 = arith.constant dense<0xFF800000> : vector<16xf32>
    %146 = vector.multi_reduction <maximumf>, %145, %cst_72 [1] : vector<16x16xf32> to vector<16xf32>
    %147 = vector.shape_cast %146 : vector<16xf32> to vector<16x1xf32>
    %148 = vector.broadcast %147 : vector<16x1xf32> to vector<16x16xf32>
    %149 = arith.subf %145, %148 : vector<16x16xf32>
    %150 = math.exp %149 : vector<16x16xf32>
    %cst_73 = arith.constant dense<0.000000e+00> : vector<16xf32>
    %151 = vector.multi_reduction <add>, %150, %cst_73 [1] : vector<16x16xf32> to vector<16xf32>
    %152 = vector.shape_cast %151 : vector<16xf32> to vector<16x1xf32>
    %153 = vector.broadcast %152 : vector<16x1xf32> to vector<16x16xf32>
    %154 = arith.divf %150, %153 : vector<16x16xf32>
    %155 = vector.extract_strided_slice %154 {offsets = [0, 0], sizes = [8, 8], strides = [1, 1]} : vector<16x16xf32> to vector<8x8xf32>
    %c0_74 = arith.constant 0 : index
    %c0_75 = arith.constant 0 : index
    %c3_76 = arith.constant 3 : index
    %c0_77 = arith.constant 0 : index
    %c0_78 = arith.constant 0 : index
    %156 = vector.load %arg9[%c0_74, %c0_75, %c3_76, %c0_77, %c0_78] : memref<2x2x4x8x8xf32, #tpu.memory_space<vmem>>, vector<1x1x1x8x8xf32>
    %157 = vector.shape_cast %156 : vector<1x1x1x8x8xf32> to vector<8x8xf32>
    %158 = vector.shape_cast %155 : vector<8x8xf32> to vector<1x1x1x8x8xf32>
    tpu.vector_store %arg9[%c0_74, %c0_75, %c3_76, %c0_77, %c0_78], %158 {strides = array<i32>} : memref<2x2x4x8x8xf32, #tpu.memory_space<vmem>>, vector<1x1x1x8x8xf32>,
    %159 = vector.extract_strided_slice %154 {offsets = [8, 8], sizes = [8, 8], strides = [1, 1]} : vector<16x16xf32> to vector<8x8xf32>
    %c0_79 = arith.constant 0 : index
    %c1_80 = arith.constant 1 : index
    %c3_81 = arith.constant 3 : index
    %c0_82 = arith.constant 0 : index
    %c0_83 = arith.constant 0 : index
    %160 = vector.load %arg9[%c0_79, %c1_80, %c3_81, %c0_82, %c0_83] : memref<2x2x4x8x8xf32, #tpu.memory_space<vmem>>, vector<1x1x1x8x8xf32>
    %161 = vector.shape_cast %160 : vector<1x1x1x8x8xf32> to vector<8x8xf32>
    %162 = vector.shape_cast %159 : vector<8x8xf32> to vector<1x1x1x8x8xf32>
    tpu.vector_store %arg9[%c0_79, %c1_80, %c3_81, %c0_82, %c0_83], %162 {strides = array<i32>} : memref<2x2x4x8x8xf32, #tpu.memory_space<vmem>>, vector<1x1x1x8x8xf32>,
    %cst_84 = arith.constant dense<0.000000e+00> : vector<16x8xf32>
    %163 = tpu.matmul %154, %139, %cst_84 {dimension_numbers = #tpu.dot_dimension_numbers<[1], [0], [0], [1], [0, 0, 1, 1], [], []>} : vector<16x16xf32>, vector<16x8xf32>, vector<16x8xf32> -> vector<16x8xf32>
    %164 = tpu.concatenate %82, %109, %136, %163 in 1 : vector<16x8xf32>, vector<16x8xf32>, vector<16x8xf32>, vector<16x8xf32> -> vector<16x32xf32>
    %c0_85 = arith.constant 0 : index
    %c0_86 = arith.constant 0 : index
    %c0_87 = arith.constant 0 : index
    %165 = vector.load %arg4[%c0_85, %c0_86, %c0_87] : memref<2x32x32xf32, #tpu.memory_space<vmem>>, vector<1x32x32xf32>
    %166 = vector.shape_cast %165 : vector<1x32x32xf32> to vector<32x32xf32>
    %cst_88 = arith.constant dense<0.000000e+00> : vector<16x32xf32>
    %167 = tpu.matmul %164, %166, %cst_88 {dimension_numbers = #tpu.dot_dimension_numbers<[1], [0], [0], [1], [0, 0, 1, 1], [], []>} : vector<16x32xf32>, vector<32x32xf32>, vector<16x32xf32> -> vector<16x32xf32>
    %168 = arith.addf %14, %167 : vector<16x32xf32>
    %169 = vector.broadcast %26 : vector<1x32xf32> to vector<16x32xf32>
    %170 = arith.addf %168, %169 : vector<16x32xf32>
    %cst_89 = arith.constant dense<0.000000e+00> : vector<16xf32>
    %171 = vector.multi_reduction <add>, %170, %cst_89 [1] : vector<16x32xf32> to vector<16xf32>
    %172 = vector.shape_cast %171 : vector<16xf32> to vector<16x1xf32>
    %cst_90 = arith.constant 3.200000e+01 : f32
    %173 = vector.broadcast %cst_90 : f32 to vector<16x1xf32>
    %174 = arith.divf %172, %173 : vector<16x1xf32>
    %175 = vector.broadcast %174 : vector<16x1xf32> to vector<16x32xf32>
    %176 = arith.subf %170, %175 : vector<16x32xf32>
    %177 = arith.mulf %176, %176 : vector<16x32xf32>
    %cst_91 = arith.constant dense<0.000000e+00> : vector<16xf32>
    %178 = vector.multi_reduction <add>, %177, %cst_91 [1] : vector<16x32xf32> to vector<16xf32>
    %179 = vector.shape_cast %178 : vector<16xf32> to vector<16x1xf32>
    %cst_92 = arith.constant 3.200000e+01 : f32
    %180 = vector.broadcast %cst_92 : f32 to vector<16x1xf32>
    %181 = arith.divf %179, %180 : vector<16x1xf32>
    %182 = vector.broadcast %174 : vector<16x1xf32> to vector<16x32xf32>
    %183 = arith.subf %170, %182 : vector<16x32xf32>
    %cst_93 = arith.constant 9.99999974E-6 : f32
    %184 = vector.broadcast %cst_93 : f32 to vector<16x1xf32>
    %185 = arith.addf %181, %184 : vector<16x1xf32>
    %186 = math.rsqrt %185 : vector<16x1xf32>
    %187 = vector.broadcast %186 : vector<16x1xf32> to vector<16x32xf32>
    %188 = arith.mulf %183, %187 : vector<16x32xf32>
    %189 = vector.broadcast %27 : vector<1x32xf32> to vector<16x32xf32>
    %190 = arith.mulf %188, %189 : vector<16x32xf32>
    %191 = vector.broadcast %28 : vector<1x32xf32> to vector<16x32xf32>
    %192 = arith.addf %190, %191 : vector<16x32xf32>
    %c0_94 = arith.constant 0 : index
    %c0_95 = arith.constant 0 : index
    %c0_96 = arith.constant 0 : index
    %193 = vector.load %arg5[%c0_94, %c0_95, %c0_96] : memref<2x32x128xf32, #tpu.memory_space<vmem>>, vector<1x32x128xf32>
    %194 = vector.shape_cast %193 : vector<1x32x128xf32> to vector<32x128xf32>
    %cst_97 = arith.constant dense<0.000000e+00> : vector<16x128xf32>
    %195 = tpu.matmul %192, %194, %cst_97 {dimension_numbers = #tpu.dot_dimension_numbers<[1], [0], [0], [1], [0, 0, 1, 1], [], []>} : vector<16x32xf32>, vector<32x128xf32>, vector<16x128xf32> -> vector<16x128xf32>
    %196 = vector.broadcast %30 : vector<1x128xf32> to vector<16x128xf32>
    %197 = arith.addf %195, %196 : vector<16x128xf32>
    %cst_98 = arith.constant 0.000000e+00 : f32
    %198 = vector.broadcast %cst_98 : f32 to vector<16x128xf32>
    %199 = arith.maximumf %197, %198 : vector<16x128xf32>
    %c0_99 = arith.constant 0 : index
    %c0_100 = arith.constant 0 : index
    %c0_101 = arith.constant 0 : index
    %200 = vector.load %arg6[%c0_99, %c0_100, %c0_101] : memref<2x128x32xf32, #tpu.memory_space<vmem>>, vector<1x128x32xf32>
    %201 = vector.shape_cast %200 : vector<1x128x32xf32> to vector<128x32xf32>
    %cst_102 = arith.constant dense<0.000000e+00> : vector<16x32xf32>
    %202 = tpu.matmul %199, %201, %cst_102 {dimension_numbers = #tpu.dot_dimension_numbers<[1], [0], [0], [1], [0, 0, 1, 1], [], []>} : vector<16x128xf32>, vector<128x32xf32>, vector<16x32xf32> -> vector<16x32xf32>
    %203 = arith.addf %170, %202 : vector<16x32xf32>
    %204 = vector.broadcast %29 : vector<1x32xf32> to vector<16x32xf32>
    %205 = arith.addf %203, %204 : vector<16x32xf32>
    %c6 = arith.constant 6 : index
    %c0_103 = arith.constant 0 : index
    %206 = vector.load %arg2[%c6, %c0_103] : memref<15x128xf32, #tpu.memory_space<vmem>>, vector<1x32xf32>
    %c7 = arith.constant 7 : index
    %c0_104 = arith.constant 0 : index
    %207 = vector.load %arg2[%c7, %c0_104] : memref<15x128xf32, #tpu.memory_space<vmem>>, vector<1x32xf32>
    %c8 = arith.constant 8 : index
    %c0_105 = arith.constant 0 : index
    %208 = vector.load %arg2[%c8, %c0_105] : memref<15x128xf32, #tpu.memory_space<vmem>>, vector<1x32xf32>
    %c9 = arith.constant 9 : index
    %c0_106 = arith.constant 0 : index
    %209 = vector.load %arg2[%c9, %c0_106] : memref<15x128xf32, #tpu.memory_space<vmem>>, vector<1x32xf32>
    %c10 = arith.constant 10 : index
    %c0_107 = arith.constant 0 : index
    %210 = vector.load %arg2[%c10, %c0_107] : memref<15x128xf32, #tpu.memory_space<vmem>>, vector<1x32xf32>
    %c11 = arith.constant 11 : index
    %c0_108 = arith.constant 0 : index
    %211 = vector.load %arg2[%c11, %c0_108] : memref<15x128xf32, #tpu.memory_space<vmem>>, vector<1x32xf32>
    %c13 = arith.constant 13 : index
    %c0_109 = arith.constant 0 : index
    %212 = vector.load %arg2[%c13, %c0_109] : memref<15x128xf32, #tpu.memory_space<vmem>>, vector<1x128xf32>
    %cst_110 = arith.constant dense<0.000000e+00> : vector<16xf32>
    %213 = vector.multi_reduction <add>, %205, %cst_110 [1] : vector<16x32xf32> to vector<16xf32>
    %214 = vector.shape_cast %213 : vector<16xf32> to vector<16x1xf32>
    %cst_111 = arith.constant 3.200000e+01 : f32
    %215 = vector.broadcast %cst_111 : f32 to vector<16x1xf32>
    %216 = arith.divf %214, %215 : vector<16x1xf32>
    %217 = vector.broadcast %216 : vector<16x1xf32> to vector<16x32xf32>
    %218 = arith.subf %205, %217 : vector<16x32xf32>
    %219 = arith.mulf %218, %218 : vector<16x32xf32>
    %cst_112 = arith.constant dense<0.000000e+00> : vector<16xf32>
    %220 = vector.multi_reduction <add>, %219, %cst_112 [1] : vector<16x32xf32> to vector<16xf32>
    %221 = vector.shape_cast %220 : vector<16xf32> to vector<16x1xf32>
    %cst_113 = arith.constant 3.200000e+01 : f32
    %222 = vector.broadcast %cst_113 : f32 to vector<16x1xf32>
    %223 = arith.divf %221, %222 : vector<16x1xf32>
    %224 = vector.broadcast %216 : vector<16x1xf32> to vector<16x32xf32>
    %225 = arith.subf %205, %224 : vector<16x32xf32>
    %cst_114 = arith.constant 9.99999974E-6 : f32
    %226 = vector.broadcast %cst_114 : f32 to vector<16x1xf32>
    %227 = arith.addf %223, %226 : vector<16x1xf32>
    %228 = math.rsqrt %227 : vector<16x1xf32>
    %229 = vector.broadcast %228 : vector<16x1xf32> to vector<16x32xf32>
    %230 = arith.mulf %225, %229 : vector<16x32xf32>
    %231 = vector.broadcast %206 : vector<1x32xf32> to vector<16x32xf32>
    %232 = arith.mulf %230, %231 : vector<16x32xf32>
    %233 = vector.broadcast %207 : vector<1x32xf32> to vector<16x32xf32>
    %234 = arith.addf %232, %233 : vector<16x32xf32>
    %c1_115 = arith.constant 1 : index
    %c0_116 = arith.constant 0 : index
    %c0_117 = arith.constant 0 : index
    %235 = vector.load %arg3[%c1_115, %c0_116, %c0_117] : memref<2x32x96xf32, #tpu.memory_space<vmem>>, vector<1x32x96xf32>
    %236 = vector.shape_cast %235 : vector<1x32x96xf32> to vector<32x96xf32>
    %cst_118 = arith.constant dense<0.000000e+00> : vector<16x96xf32>
    %237 = tpu.matmul %234, %236, %cst_118 {dimension_numbers = #tpu.dot_dimension_numbers<[1], [0], [0], [1], [0, 0, 1, 1], [], []>} : vector<16x32xf32>, vector<32x96xf32>, vector<16x96xf32> -> vector<16x96xf32>
    %238 = vector.extract_strided_slice %237 {offsets = [0, 0], sizes = [16, 8], strides = [1, 1]} : vector<16x96xf32> to vector<16x8xf32>
    %239 = vector.extract_strided_slice %237 {offsets = [0, 32], sizes = [16, 8], strides = [1, 1]} : vector<16x96xf32> to vector<16x8xf32>
    %240 = vector.extract_strided_slice %237 {offsets = [0, 64], sizes = [16, 8], strides = [1, 1]} : vector<16x96xf32> to vector<16x8xf32>
    %241 = tpu.transpose %239, [1, 0] : vector<16x8xf32> -> vector<8x16xf32>
    %cst_119 = arith.constant dense<0.000000e+00> : vector<16x16xf32>
    %242 = tpu.matmul %238, %241, %cst_119 {dimension_numbers = #tpu.dot_dimension_numbers<[1], [0], [0], [1], [0, 0, 1, 1], [], []>} : vector<16x8xf32>, vector<8x16xf32>, vector<16x16xf32> -> vector<16x16xf32>
    %cst_120 = arith.constant 0.353553385 : f32
    %243 = vector.broadcast %cst_120 : f32 to vector<16x16xf32>
    %244 = arith.mulf %242, %243 : vector<16x16xf32>
    %cst_121 = arith.constant -1.000000e+30 : f32
    %245 = vector.broadcast %cst_121 : f32 to vector<16x16xf32>
    %246 = arith.select %23, %244, %245 : vector<16x16xi1>, vector<16x16xf32>
    %cst_122 = arith.constant dense<0xFF800000> : vector<16xf32>
    %247 = vector.multi_reduction <maximumf>, %246, %cst_122 [1] : vector<16x16xf32> to vector<16xf32>
    %248 = vector.shape_cast %247 : vector<16xf32> to vector<16x1xf32>
    %249 = vector.broadcast %248 : vector<16x1xf32> to vector<16x16xf32>
    %250 = arith.subf %246, %249 : vector<16x16xf32>
    %251 = math.exp %250 : vector<16x16xf32>
    %cst_123 = arith.constant dense<0.000000e+00> : vector<16xf32>
    %252 = vector.multi_reduction <add>, %251, %cst_123 [1] : vector<16x16xf32> to vector<16xf32>
    %253 = vector.shape_cast %252 : vector<16xf32> to vector<16x1xf32>
    %254 = vector.broadcast %253 : vector<16x1xf32> to vector<16x16xf32>
    %255 = arith.divf %251, %254 : vector<16x16xf32>
    %256 = vector.extract_strided_slice %255 {offsets = [0, 0], sizes = [8, 8], strides = [1, 1]} : vector<16x16xf32> to vector<8x8xf32>
    %c1_124 = arith.constant 1 : index
    %c0_125 = arith.constant 0 : index
    %c0_126 = arith.constant 0 : index
    %c0_127 = arith.constant 0 : index
    %c0_128 = arith.constant 0 : index
    %257 = vector.load %arg9[%c1_124, %c0_125, %c0_126, %c0_127, %c0_128] : memref<2x2x4x8x8xf32, #tpu.memory_space<vmem>>, vector<1x1x1x8x8xf32>
    %258 = vector.shape_cast %257 : vector<1x1x1x8x8xf32> to vector<8x8xf32>
    %259 = vector.shape_cast %256 : vector<8x8xf32> to vector<1x1x1x8x8xf32>
    tpu.vector_store %arg9[%c1_124, %c0_125, %c0_126, %c0_127, %c0_128], %259 {strides = array<i32>} : memref<2x2x4x8x8xf32, #tpu.memory_space<vmem>>, vector<1x1x1x8x8xf32>,
    %260 = vector.extract_strided_slice %255 {offsets = [8, 8], sizes = [8, 8], strides = [1, 1]} : vector<16x16xf32> to vector<8x8xf32>
    %c1_129 = arith.constant 1 : index
    %c1_130 = arith.constant 1 : index
    %c0_131 = arith.constant 0 : index
    %c0_132 = arith.constant 0 : index
    %c0_133 = arith.constant 0 : index
    %261 = vector.load %arg9[%c1_129, %c1_130, %c0_131, %c0_132, %c0_133] : memref<2x2x4x8x8xf32, #tpu.memory_space<vmem>>, vector<1x1x1x8x8xf32>
    %262 = vector.shape_cast %261 : vector<1x1x1x8x8xf32> to vector<8x8xf32>
    %263 = vector.shape_cast %260 : vector<8x8xf32> to vector<1x1x1x8x8xf32>
    tpu.vector_store %arg9[%c1_129, %c1_130, %c0_131, %c0_132, %c0_133], %263 {strides = array<i32>} : memref<2x2x4x8x8xf32, #tpu.memory_space<vmem>>, vector<1x1x1x8x8xf32>,
    %cst_134 = arith.constant dense<0.000000e+00> : vector<16x8xf32>
    %264 = tpu.matmul %255, %240, %cst_134 {dimension_numbers = #tpu.dot_dimension_numbers<[1], [0], [0], [1], [0, 0, 1, 1], [], []>} : vector<16x16xf32>, vector<16x8xf32>, vector<16x8xf32> -> vector<16x8xf32>
    %265 = vector.extract_strided_slice %237 {offsets = [0, 8], sizes = [16, 8], strides = [1, 1]} : vector<16x96xf32> to vector<16x8xf32>
    %266 = vector.extract_strided_slice %237 {offsets = [0, 40], sizes = [16, 8], strides = [1, 1]} : vector<16x96xf32> to vector<16x8xf32>
    %267 = vector.extract_strided_slice %237 {offsets = [0, 72], sizes = [16, 8], strides = [1, 1]} : vector<16x96xf32> to vector<16x8xf32>
    %268 = tpu.transpose %266, [1, 0] : vector<16x8xf32> -> vector<8x16xf32>
    %cst_135 = arith.constant dense<0.000000e+00> : vector<16x16xf32>
    %269 = tpu.matmul %265, %268, %cst_135 {dimension_numbers = #tpu.dot_dimension_numbers<[1], [0], [0], [1], [0, 0, 1, 1], [], []>} : vector<16x8xf32>, vector<8x16xf32>, vector<16x16xf32> -> vector<16x16xf32>
    %cst_136 = arith.constant 0.353553385 : f32
    %270 = vector.broadcast %cst_136 : f32 to vector<16x16xf32>
    %271 = arith.mulf %269, %270 : vector<16x16xf32>
    %cst_137 = arith.constant -1.000000e+30 : f32
    %272 = vector.broadcast %cst_137 : f32 to vector<16x16xf32>
    %273 = arith.select %23, %271, %272 : vector<16x16xi1>, vector<16x16xf32>
    %cst_138 = arith.constant dense<0xFF800000> : vector<16xf32>
    %274 = vector.multi_reduction <maximumf>, %273, %cst_138 [1] : vector<16x16xf32> to vector<16xf32>
    %275 = vector.shape_cast %274 : vector<16xf32> to vector<16x1xf32>
    %276 = vector.broadcast %275 : vector<16x1xf32> to vector<16x16xf32>
    %277 = arith.subf %273, %276 : vector<16x16xf32>
    %278 = math.exp %277 : vector<16x16xf32>
    %cst_139 = arith.constant dense<0.000000e+00> : vector<16xf32>
    %279 = vector.multi_reduction <add>, %278, %cst_139 [1] : vector<16x16xf32> to vector<16xf32>
    %280 = vector.shape_cast %279 : vector<16xf32> to vector<16x1xf32>
    %281 = vector.broadcast %280 : vector<16x1xf32> to vector<16x16xf32>
    %282 = arith.divf %278, %281 : vector<16x16xf32>
    %283 = vector.extract_strided_slice %282 {offsets = [0, 0], sizes = [8, 8], strides = [1, 1]} : vector<16x16xf32> to vector<8x8xf32>
    %c1_140 = arith.constant 1 : index
    %c0_141 = arith.constant 0 : index
    %c1_142 = arith.constant 1 : index
    %c0_143 = arith.constant 0 : index
    %c0_144 = arith.constant 0 : index
    %284 = vector.load %arg9[%c1_140, %c0_141, %c1_142, %c0_143, %c0_144] : memref<2x2x4x8x8xf32, #tpu.memory_space<vmem>>, vector<1x1x1x8x8xf32>
    %285 = vector.shape_cast %284 : vector<1x1x1x8x8xf32> to vector<8x8xf32>
    %286 = vector.shape_cast %283 : vector<8x8xf32> to vector<1x1x1x8x8xf32>
    tpu.vector_store %arg9[%c1_140, %c0_141, %c1_142, %c0_143, %c0_144], %286 {strides = array<i32>} : memref<2x2x4x8x8xf32, #tpu.memory_space<vmem>>, vector<1x1x1x8x8xf32>,
    %287 = vector.extract_strided_slice %282 {offsets = [8, 8], sizes = [8, 8], strides = [1, 1]} : vector<16x16xf32> to vector<8x8xf32>
    %c1_145 = arith.constant 1 : index
    %c1_146 = arith.constant 1 : index
    %c1_147 = arith.constant 1 : index
    %c0_148 = arith.constant 0 : index
    %c0_149 = arith.constant 0 : index
    %288 = vector.load %arg9[%c1_145, %c1_146, %c1_147, %c0_148, %c0_149] : memref<2x2x4x8x8xf32, #tpu.memory_space<vmem>>, vector<1x1x1x8x8xf32>
    %289 = vector.shape_cast %288 : vector<1x1x1x8x8xf32> to vector<8x8xf32>
    %290 = vector.shape_cast %287 : vector<8x8xf32> to vector<1x1x1x8x8xf32>
    tpu.vector_store %arg9[%c1_145, %c1_146, %c1_147, %c0_148, %c0_149], %290 {strides = array<i32>} : memref<2x2x4x8x8xf32, #tpu.memory_space<vmem>>, vector<1x1x1x8x8xf32>,
    %cst_150 = arith.constant dense<0.000000e+00> : vector<16x8xf32>
    %291 = tpu.matmul %282, %267, %cst_150 {dimension_numbers = #tpu.dot_dimension_numbers<[1], [0], [0], [1], [0, 0, 1, 1], [], []>} : vector<16x16xf32>, vector<16x8xf32>, vector<16x8xf32> -> vector<16x8xf32>
    %292 = vector.extract_strided_slice %237 {offsets = [0, 16], sizes = [16, 8], strides = [1, 1]} : vector<16x96xf32> to vector<16x8xf32>
    %293 = vector.extract_strided_slice %237 {offsets = [0, 48], sizes = [16, 8], strides = [1, 1]} : vector<16x96xf32> to vector<16x8xf32>
    %294 = vector.extract_strided_slice %237 {offsets = [0, 80], sizes = [16, 8], strides = [1, 1]} : vector<16x96xf32> to vector<16x8xf32>
    %295 = tpu.transpose %293, [1, 0] : vector<16x8xf32> -> vector<8x16xf32>
    %cst_151 = arith.constant dense<0.000000e+00> : vector<16x16xf32>
    %296 = tpu.matmul %292, %295, %cst_151 {dimension_numbers = #tpu.dot_dimension_numbers<[1], [0], [0], [1], [0, 0, 1, 1], [], []>} : vector<16x8xf32>, vector<8x16xf32>, vector<16x16xf32> -> vector<16x16xf32>
    %cst_152 = arith.constant 0.353553385 : f32
    %297 = vector.broadcast %cst_152 : f32 to vector<16x16xf32>
    %298 = arith.mulf %296, %297 : vector<16x16xf32>
    %cst_153 = arith.constant -1.000000e+30 : f32
    %299 = vector.broadcast %cst_153 : f32 to vector<16x16xf32>
    %300 = arith.select %23, %298, %299 : vector<16x16xi1>, vector<16x16xf32>
    %cst_154 = arith.constant dense<0xFF800000> : vector<16xf32>
    %301 = vector.multi_reduction <maximumf>, %300, %cst_154 [1] : vector<16x16xf32> to vector<16xf32>
    %302 = vector.shape_cast %301 : vector<16xf32> to vector<16x1xf32>
    %303 = vector.broadcast %302 : vector<16x1xf32> to vector<16x16xf32>
    %304 = arith.subf %300, %303 : vector<16x16xf32>
    %305 = math.exp %304 : vector<16x16xf32>
    %cst_155 = arith.constant dense<0.000000e+00> : vector<16xf32>
    %306 = vector.multi_reduction <add>, %305, %cst_155 [1] : vector<16x16xf32> to vector<16xf32>
    %307 = vector.shape_cast %306 : vector<16xf32> to vector<16x1xf32>
    %308 = vector.broadcast %307 : vector<16x1xf32> to vector<16x16xf32>
    %309 = arith.divf %305, %308 : vector<16x16xf32>
    %310 = vector.extract_strided_slice %309 {offsets = [0, 0], sizes = [8, 8], strides = [1, 1]} : vector<16x16xf32> to vector<8x8xf32>
    %c1_156 = arith.constant 1 : index
    %c0_157 = arith.constant 0 : index
    %c2_158 = arith.constant 2 : index
    %c0_159 = arith.constant 0 : index
    %c0_160 = arith.constant 0 : index
    %311 = vector.load %arg9[%c1_156, %c0_157, %c2_158, %c0_159, %c0_160] : memref<2x2x4x8x8xf32, #tpu.memory_space<vmem>>, vector<1x1x1x8x8xf32>
    %312 = vector.shape_cast %311 : vector<1x1x1x8x8xf32> to vector<8x8xf32>
    %313 = vector.shape_cast %310 : vector<8x8xf32> to vector<1x1x1x8x8xf32>
    tpu.vector_store %arg9[%c1_156, %c0_157, %c2_158, %c0_159, %c0_160], %313 {strides = array<i32>} : memref<2x2x4x8x8xf32, #tpu.memory_space<vmem>>, vector<1x1x1x8x8xf32>,
    %314 = vector.extract_strided_slice %309 {offsets = [8, 8], sizes = [8, 8], strides = [1, 1]} : vector<16x16xf32> to vector<8x8xf32>
    %c1_161 = arith.constant 1 : index
    %c1_162 = arith.constant 1 : index
    %c2_163 = arith.constant 2 : index
    %c0_164 = arith.constant 0 : index
    %c0_165 = arith.constant 0 : index
    %315 = vector.load %arg9[%c1_161, %c1_162, %c2_163, %c0_164, %c0_165] : memref<2x2x4x8x8xf32, #tpu.memory_space<vmem>>, vector<1x1x1x8x8xf32>
    %316 = vector.shape_cast %315 : vector<1x1x1x8x8xf32> to vector<8x8xf32>
    %317 = vector.shape_cast %314 : vector<8x8xf32> to vector<1x1x1x8x8xf32>
    tpu.vector_store %arg9[%c1_161, %c1_162, %c2_163, %c0_164, %c0_165], %317 {strides = array<i32>} : memref<2x2x4x8x8xf32, #tpu.memory_space<vmem>>, vector<1x1x1x8x8xf32>,
    %cst_166 = arith.constant dense<0.000000e+00> : vector<16x8xf32>
    %318 = tpu.matmul %309, %294, %cst_166 {dimension_numbers = #tpu.dot_dimension_numbers<[1], [0], [0], [1], [0, 0, 1, 1], [], []>} : vector<16x16xf32>, vector<16x8xf32>, vector<16x8xf32> -> vector<16x8xf32>
    %319 = vector.extract_strided_slice %237 {offsets = [0, 24], sizes = [16, 8], strides = [1, 1]} : vector<16x96xf32> to vector<16x8xf32>
    %320 = vector.extract_strided_slice %237 {offsets = [0, 56], sizes = [16, 8], strides = [1, 1]} : vector<16x96xf32> to vector<16x8xf32>
    %321 = vector.extract_strided_slice %237 {offsets = [0, 88], sizes = [16, 8], strides = [1, 1]} : vector<16x96xf32> to vector<16x8xf32>
    %322 = tpu.transpose %320, [1, 0] : vector<16x8xf32> -> vector<8x16xf32>
    %cst_167 = arith.constant dense<0.000000e+00> : vector<16x16xf32>
    %323 = tpu.matmul %319, %322, %cst_167 {dimension_numbers = #tpu.dot_dimension_numbers<[1], [0], [0], [1], [0, 0, 1, 1], [], []>} : vector<16x8xf32>, vector<8x16xf32>, vector<16x16xf32> -> vector<16x16xf32>
    %cst_168 = arith.constant 0.353553385 : f32
    %324 = vector.broadcast %cst_168 : f32 to vector<16x16xf32>
    %325 = arith.mulf %323, %324 : vector<16x16xf32>
    %cst_169 = arith.constant -1.000000e+30 : f32
    %326 = vector.broadcast %cst_169 : f32 to vector<16x16xf32>
    %327 = arith.select %23, %325, %326 : vector<16x16xi1>, vector<16x16xf32>
    %cst_170 = arith.constant dense<0xFF800000> : vector<16xf32>
    %328 = vector.multi_reduction <maximumf>, %327, %cst_170 [1] : vector<16x16xf32> to vector<16xf32>
    %329 = vector.shape_cast %328 : vector<16xf32> to vector<16x1xf32>
    %330 = vector.broadcast %329 : vector<16x1xf32> to vector<16x16xf32>
    %331 = arith.subf %327, %330 : vector<16x16xf32>
    %332 = math.exp %331 : vector<16x16xf32>
    %cst_171 = arith.constant dense<0.000000e+00> : vector<16xf32>
    %333 = vector.multi_reduction <add>, %332, %cst_171 [1] : vector<16x16xf32> to vector<16xf32>
    %334 = vector.shape_cast %333 : vector<16xf32> to vector<16x1xf32>
    %335 = vector.broadcast %334 : vector<16x1xf32> to vector<16x16xf32>
    %336 = arith.divf %332, %335 : vector<16x16xf32>
    %337 = vector.extract_strided_slice %336 {offsets = [0, 0], sizes = [8, 8], strides = [1, 1]} : vector<16x16xf32> to vector<8x8xf32>
    %c1_172 = arith.constant 1 : index
    %c0_173 = arith.constant 0 : index
    %c3_174 = arith.constant 3 : index
    %c0_175 = arith.constant 0 : index
    %c0_176 = arith.constant 0 : index
    %338 = vector.load %arg9[%c1_172, %c0_173, %c3_174, %c0_175, %c0_176] : memref<2x2x4x8x8xf32, #tpu.memory_space<vmem>>, vector<1x1x1x8x8xf32>
    %339 = vector.shape_cast %338 : vector<1x1x1x8x8xf32> to vector<8x8xf32>
    %340 = vector.shape_cast %337 : vector<8x8xf32> to vector<1x1x1x8x8xf32>
    tpu.vector_store %arg9[%c1_172, %c0_173, %c3_174, %c0_175, %c0_176], %340 {strides = array<i32>} : memref<2x2x4x8x8xf32, #tpu.memory_space<vmem>>, vector<1x1x1x8x8xf32>,
    %341 = vector.extract_strided_slice %336 {offsets = [8, 8], sizes = [8, 8], strides = [1, 1]} : vector<16x16xf32> to vector<8x8xf32>
    %c1_177 = arith.constant 1 : index
    %c1_178 = arith.constant 1 : index
    %c3_179 = arith.constant 3 : index
    %c0_180 = arith.constant 0 : index
    %c0_181 = arith.constant 0 : index
    %342 = vector.load %arg9[%c1_177, %c1_178, %c3_179, %c0_180, %c0_181] : memref<2x2x4x8x8xf32, #tpu.memory_space<vmem>>, vector<1x1x1x8x8xf32>
    %343 = vector.shape_cast %342 : vector<1x1x1x8x8xf32> to vector<8x8xf32>
    %344 = vector.shape_cast %341 : vector<8x8xf32> to vector<1x1x1x8x8xf32>
    tpu.vector_store %arg9[%c1_177, %c1_178, %c3_179, %c0_180, %c0_181], %344 {strides = array<i32>} : memref<2x2x4x8x8xf32, #tpu.memory_space<vmem>>, vector<1x1x1x8x8xf32>,
    %cst_182 = arith.constant dense<0.000000e+00> : vector<16x8xf32>
    %345 = tpu.matmul %336, %321, %cst_182 {dimension_numbers = #tpu.dot_dimension_numbers<[1], [0], [0], [1], [0, 0, 1, 1], [], []>} : vector<16x16xf32>, vector<16x8xf32>, vector<16x8xf32> -> vector<16x8xf32>
    %346 = tpu.concatenate %264, %291, %318, %345 in 1 : vector<16x8xf32>, vector<16x8xf32>, vector<16x8xf32>, vector<16x8xf32> -> vector<16x32xf32>
    %c1_183 = arith.constant 1 : index
    %c0_184 = arith.constant 0 : index
    %c0_185 = arith.constant 0 : index
    %347 = vector.load %arg4[%c1_183, %c0_184, %c0_185] : memref<2x32x32xf32, #tpu.memory_space<vmem>>, vector<1x32x32xf32>
    %348 = vector.shape_cast %347 : vector<1x32x32xf32> to vector<32x32xf32>
    %cst_186 = arith.constant dense<0.000000e+00> : vector<16x32xf32>
    %349 = tpu.matmul %346, %348, %cst_186 {dimension_numbers = #tpu.dot_dimension_numbers<[1], [0], [0], [1], [0, 0, 1, 1], [], []>} : vector<16x32xf32>, vector<32x32xf32>, vector<16x32xf32> -> vector<16x32xf32>
    %350 = arith.addf %205, %349 : vector<16x32xf32>
    %351 = vector.broadcast %208 : vector<1x32xf32> to vector<16x32xf32>
    %352 = arith.addf %350, %351 : vector<16x32xf32>
    %cst_187 = arith.constant dense<0.000000e+00> : vector<16xf32>
    %353 = vector.multi_reduction <add>, %352, %cst_187 [1] : vector<16x32xf32> to vector<16xf32>
    %354 = vector.shape_cast %353 : vector<16xf32> to vector<16x1xf32>
    %cst_188 = arith.constant 3.200000e+01 : f32
    %355 = vector.broadcast %cst_188 : f32 to vector<16x1xf32>
    %356 = arith.divf %354, %355 : vector<16x1xf32>
    %357 = vector.broadcast %356 : vector<16x1xf32> to vector<16x32xf32>
    %358 = arith.subf %352, %357 : vector<16x32xf32>
    %359 = arith.mulf %358, %358 : vector<16x32xf32>
    %cst_189 = arith.constant dense<0.000000e+00> : vector<16xf32>
    %360 = vector.multi_reduction <add>, %359, %cst_189 [1] : vector<16x32xf32> to vector<16xf32>
    %361 = vector.shape_cast %360 : vector<16xf32> to vector<16x1xf32>
    %cst_190 = arith.constant 3.200000e+01 : f32
    %362 = vector.broadcast %cst_190 : f32 to vector<16x1xf32>
    %363 = arith.divf %361, %362 : vector<16x1xf32>
    %364 = vector.broadcast %356 : vector<16x1xf32> to vector<16x32xf32>
    %365 = arith.subf %352, %364 : vector<16x32xf32>
    %cst_191 = arith.constant 9.99999974E-6 : f32
    %366 = vector.broadcast %cst_191 : f32 to vector<16x1xf32>
    %367 = arith.addf %363, %366 : vector<16x1xf32>
    %368 = math.rsqrt %367 : vector<16x1xf32>
    %369 = vector.broadcast %368 : vector<16x1xf32> to vector<16x32xf32>
    %370 = arith.mulf %365, %369 : vector<16x32xf32>
    %371 = vector.broadcast %209 : vector<1x32xf32> to vector<16x32xf32>
    %372 = arith.mulf %370, %371 : vector<16x32xf32>
    %373 = vector.broadcast %210 : vector<1x32xf32> to vector<16x32xf32>
    %374 = arith.addf %372, %373 : vector<16x32xf32>
    %c1_192 = arith.constant 1 : index
    %c0_193 = arith.constant 0 : index
    %c0_194 = arith.constant 0 : index
    %375 = vector.load %arg5[%c1_192, %c0_193, %c0_194] : memref<2x32x128xf32, #tpu.memory_space<vmem>>, vector<1x32x128xf32>
    %376 = vector.shape_cast %375 : vector<1x32x128xf32> to vector<32x128xf32>
    %cst_195 = arith.constant dense<0.000000e+00> : vector<16x128xf32>
    %377 = tpu.matmul %374, %376, %cst_195 {dimension_numbers = #tpu.dot_dimension_numbers<[1], [0], [0], [1], [0, 0, 1, 1], [], []>} : vector<16x32xf32>, vector<32x128xf32>, vector<16x128xf32> -> vector<16x128xf32>
    %378 = vector.broadcast %212 : vector<1x128xf32> to vector<16x128xf32>
    %379 = arith.addf %377, %378 : vector<16x128xf32>
    %cst_196 = arith.constant 0.000000e+00 : f32
    %380 = vector.broadcast %cst_196 : f32 to vector<16x128xf32>
    %381 = arith.maximumf %379, %380 : vector<16x128xf32>
    %c1_197 = arith.constant 1 : index
    %c0_198 = arith.constant 0 : index
    %c0_199 = arith.constant 0 : index
    %382 = vector.load %arg6[%c1_197, %c0_198, %c0_199] : memref<2x128x32xf32, #tpu.memory_space<vmem>>, vector<1x128x32xf32>
    %383 = vector.shape_cast %382 : vector<1x128x32xf32> to vector<128x32xf32>
    %cst_200 = arith.constant dense<0.000000e+00> : vector<16x32xf32>
    %384 = tpu.matmul %381, %383, %cst_200 {dimension_numbers = #tpu.dot_dimension_numbers<[1], [0], [0], [1], [0, 0, 1, 1], [], []>} : vector<16x128xf32>, vector<128x32xf32>, vector<16x32xf32> -> vector<16x32xf32>
    %385 = arith.addf %352, %384 : vector<16x32xf32>
    %386 = vector.broadcast %211 : vector<1x32xf32> to vector<16x32xf32>
    %387 = arith.addf %385, %386 : vector<16x32xf32>
    %cst_201 = arith.constant dense<0.000000e+00> : vector<16xf32>
    %388 = vector.multi_reduction <add>, %387, %cst_201 [1] : vector<16x32xf32> to vector<16xf32>
    %389 = vector.shape_cast %388 : vector<16xf32> to vector<16x1xf32>
    %cst_202 = arith.constant 3.200000e+01 : f32
    %390 = vector.broadcast %cst_202 : f32 to vector<16x1xf32>
    %391 = arith.divf %389, %390 : vector<16x1xf32>
    %392 = vector.broadcast %391 : vector<16x1xf32> to vector<16x32xf32>
    %393 = arith.subf %387, %392 : vector<16x32xf32>
    %394 = arith.mulf %393, %393 : vector<16x32xf32>
    %cst_203 = arith.constant dense<0.000000e+00> : vector<16xf32>
    %395 = vector.multi_reduction <add>, %394, %cst_203 [1] : vector<16x32xf32> to vector<16xf32>
    %396 = vector.shape_cast %395 : vector<16xf32> to vector<16x1xf32>
    %cst_204 = arith.constant 3.200000e+01 : f32
    %397 = vector.broadcast %cst_204 : f32 to vector<16x1xf32>
    %398 = arith.divf %396, %397 : vector<16x1xf32>
    %399 = vector.broadcast %391 : vector<16x1xf32> to vector<16x32xf32>
    %400 = arith.subf %387, %399 : vector<16x32xf32>
    %cst_205 = arith.constant 9.99999974E-6 : f32
    %401 = vector.broadcast %cst_205 : f32 to vector<16x1xf32>
    %402 = arith.addf %398, %401 : vector<16x1xf32>
    %403 = math.rsqrt %402 : vector<16x1xf32>
    %404 = vector.broadcast %403 : vector<16x1xf32> to vector<16x32xf32>
    %405 = arith.mulf %400, %404 : vector<16x32xf32>
    %c0_206 = arith.constant 0 : index
    %c0_207 = arith.constant 0 : index
    %406 = vector.load %arg7[%c0_206, %c0_207] : memref<32x128xf32, #tpu.memory_space<vmem>>, vector<32x128xf32>
    %cst_208 = arith.constant dense<0.000000e+00> : vector<16x128xf32>
    %407 = tpu.matmul %405, %406, %cst_208 {dimension_numbers = #tpu.dot_dimension_numbers<[1], [0], [0], [1], [0, 0, 1, 1], [], []>} : vector<16x32xf32>, vector<32x128xf32>, vector<16x128xf32> -> vector<16x128xf32>
    %c14 = arith.constant 14 : index
    %c0_209 = arith.constant 0 : index
    %408 = vector.load %arg2[%c14, %c0_209] : memref<15x128xf32, #tpu.memory_space<vmem>>, vector<1x128xf32>
    %409 = vector.broadcast %408 : vector<1x128xf32> to vector<16x128xf32>
    %410 = arith.addf %407, %409 : vector<16x128xf32>
    %c0_210 = arith.constant 0 : index
    %c0_211 = arith.constant 0 : index
    %411 = vector.load %arg8[%c0_210, %c0_211] : memref<16x128xf32, #tpu.memory_space<vmem>>, vector<16x128xf32>
    tpu.vector_store %arg8[%c0_210, %c0_211], %410 {strides = array<i32>} : memref<16x128xf32, #tpu.memory_space<vmem>>, vector<16x128xf32>,
    return
  }
}

</mosaic_0001>

<bundles_post_ra>
// kernel: forward.1
= control target key start
LH: loop header
LB: loop body
LE: loop exit
PB: predicated region body
PF: predicated region fallthrough
CT: control target
= control target key end

     0   :  { %v3888_v0 = vmov 0   ;;  %v33_v15 = vlaneseq  ;;  %vm66_vm2 = vcmask 523264   ;;  %v3889_v24 = vmov 0.0   ;;  %s3890_s18 = smov 96   ;;  %s3891_s19 = smov 88   ;;  %s4683_s0 = inlined_call_operand.vmem [shape: s32[16,1], index: 0, kind: input, shape index: {}]   ;;  %s4684_s1 = inlined_call_operand.vmem [shape: f32[64,32], index: 1, kind: input, shape index: {}]   ;;  %s4685_s3 = inlined_call_operand.vmem [shape: f32[2,32,96], index: 3, kind: input, shape index: {}]   ;;  %s4686_s2 = inlined_call_operand.vmem [shape: f32[15,128], index: 2, kind: input, shape index: {}]   ;;  %s4687_s9 = inlined_call_operand.vmem [shape: f32[2,2,4,8,8], index: 9, kind: output, shape index: {1}]   ;;  %s4688_s4 = inlined_call_operand.vmem [shape: f32[2,32,32], index: 4, kind: input, shape index: {}]   ;;  %s4689_s5 = inlined_call_operand.vmem [shape: f32[2,32,128], index: 5, kind: input, shape index: {}]   ;;  %s4690_s6 = inlined_call_operand.vmem [shape: f32[2,128,32], index: 6, kind: input, shape index: {}]   ;;  %s4691_s7 = inlined_call_operand.vmem [shape: f32[32,128], index: 7, kind: input, shape index: {}]   ;;  %s4692_s8 = inlined_call_operand.vmem [shape: f32[16,128], index: 8, kind: output, shape index: {0}]  }
   0x1   :  { %3723 = vset.pattern.permute.xlu0 %v3888_v0  ;;  %v31_v1 = vld [vmem:[%s4683_s0] sm:$0xff]  ;;  %v59_v3 = vld [vmem:[%s4684_s1 + $0x8] sm:$0xff]  ;;  %v60_v4 = vld [vmem:[%s4684_s1 + $0x10] sm:$0xff]  ;;  %vm164_vm7 = vcmask 261120   ;;  %vm295_vm8 = vcmask 64512   ;;  %s3892_s20 = smov 120  }
   0x2   :  { %v58_v2 = vld [vmem:[%s4684_s1] sm:$0xff]  ;;  %43 = vperm.xlu0 %3723, %v31_v1   ;;  %v61_v5 = vld [vmem:[%s4684_s1 + $0x18] sm:$0xff]  ;;  %v32_v6 = vld [vmem:[%s4683_s0 + $0x8] sm:$0xff]  ;;  %v3984_v16 = vshrl.u32 %v33_v15, 7  ;;  %v3990_v19 = vand.u32 127, %v33_v15  ;;  %vm383_vm15 = vcmask 130048  }
   0x3   :  { %v3491_v7 = vpack.c.bf16 %v59_v3, %v58_v2  ;;  %v3495_v8 = vpack.c.bf16 %v61_v5, %v60_v4  ;;  %v62_v9 = vld [vmem:[%s4684_s1 + $0x20] sm:$0xff]  ;;  %v63_v10 = vld [vmem:[%s4684_s1 + $0x28] sm:$0xff]  ;;  %v64_v12 = vld [vmem:[%s4684_s1 + $0x30] sm:$0xff]  ;;  %s3893_s21 = smov 56   ;;  %s3894_s22 = smov 112  }
   0x4   :  { %v3499_v11 = vpack.c.bf16 %v63_v10, %v62_v9  ;;  %v65_v13 = vld [vmem:[%s4684_s1 + $0x38] sm:$0xff]  ;;  %v38_v17 = vand.u32 7, %v3984_v16  ;;  %v3988_v18 = vadd.s32 8, %v3984_v16  ;;  %v204_v42 = vld [vmem:[%s4685_s3] sm:$0xff]  ;;  %v205_v43 = vld [vmem:[%s4685_s3 + $0x8] sm:$0xff]  ;;  %v150_v15 = vand.u32 4294967288, %v3990_v19 }
   0x5   :  { %3492 = vmatprep.subr.bf16.mxu1 %v3491_v7  ;;  %v3503_v14 = vpack.c.bf16 %v65_v13, %v64_v12  ;;  %v3507_v44 = vpack.c.bf16 %v205_v43, %v204_v42  ;;  %v206_v45 = vld [vmem:[%s4685_s3 + $0x10] sm:$0xff]  ;;  %v207_v46 = vld [vmem:[%s4685_s3 + $0x18] sm:$0xff]  ;;  %v2941_v55 = vld [vmem:[%s4686_s2] ss:$0 sm:$0xff]  ;;  %vm153_vm13 = vcmp.ge.s32.totalorder %v3984_v16, %v3990_v19  ;;  %s3895_s23 = smov 104   ;;  %s3896_s24 = smov 64  }
   0x6   :  { %46 = vperm.xlu0 %3723, %v32_v6   ;;  %3494 = vmatpush3.bf16.msra.mxu1 %v3491_v7  ;;  %v40_v20 = vadd.s32 56, %v38_v17  ;;  %v39_v21 = vand.u32 7, %v3988_v18  ;;  %v3511_v47 = vpack.c.bf16 %v207_v46, %v206_v45  ;;  %v2942_v57 = vld [vmem:[%s4686_s2 + $0x1] ss:$0 sm:$0xff]  ;;  %vm4044_vm9 = vmpackc.low %vm295_vm8, %vm295_vm8  ;;  %v148_v17 = vand.u32 4294967288, %v3984_v16  ;;  %s3897_s25 = smov 80  }
   0x7   :  { %3496 = vmatprep.subr.bf16.mxu1 %v3495_v8  ;;  %vm154_vm11 = vcmp.ge.s32.totalorder %v3988_v18, %v3990_v19  ;;  %s3898_s26 = smov 72   ;;  %s3899_s29 = smov 40  }
   0x8   :  { %vm50_vm0 = vcmp.eq.s32.totalorder %v3990_v19, %v40_v20  ;;  %v41_v22 = vadd.s32 56, %v39_v21  ;;  %vm151_vm12 = vcmp.eq.s32.totalorder %v148_v17, %v150_v15  ;;  %s3900_s30 = smov 48   ;;  %s3901_s10 = smov 8  }
   0x9   :  { %s3902_s12 = smov 16   ;;  %s4693_s13 = smov 24  }
   0xa   :  { %3498 = vmatpush3.bf16.msra.mxu1 %v3495_v8  ;;  %vm51_vm4 = vcmp.eq.s32.totalorder %v3990_v19, %v41_v22  ;;  %s4701_s1 = smov 24  }
   0xb   :  { %3500 = vmatprep.subr.bf16.mxu1 %v3499_v11 }
   0xe   :  { %3502 = vmatpush3.bf16.msra.mxu1 %v3499_v11 }
   0xf   :  { %3504 = vmatprep.subr.bf16.mxu1 %v3503_v14 }
  0x12   :  { %3506 = vmatpush3.bf16.msra.mxu1 %v3503_v14  ;;  %v149_v14 = vand.u32 4294967288, %v3988_v18 }
  0x13   :  { %3508 = vmatprep.subr.bf16.mxu1 %v3507_v44 }
  0x14   :  { %vm152_vm10 = vcmp.eq.s32.totalorder %v149_v14, %v150_v15 }
  0x15   :  { %vm4067_vm14 = vmand %vm152_vm10, %vm154_vm11 }
  0x81   :  { %v44_v23 = vpop.permute.xlu0 %43 }
  0x82   :  { %vm48_vm1 = vcmp.eq.s32.totalorder %v3990_v19, %v44_v23 }
  0x83   :  { %vm52_vm3 = vmor %vm48_vm1, %vm50_vm0  ;;  %vm1160_vm1 = vcmask 195584  }
  0x84   :  { %v2937_v25 = vsel %vm52_vm3, 1.0, %v3889_v24  ;;  %vm4071_vm0 = vmand %vm151_vm12, %vm153_vm13 }
  0x85   :  { %3229 = vmatprep.mubr.msk.f32.mxu1 %vm66_vm2, %v2937_v25  ;;  %v47_v26 = vpop.permute.xlu0 %46 }
  0x86   :  { %vm49_vm5 = vcmp.eq.s32.totalorder %v3990_v19, %v47_v26 }
  0x87   :  { %vm53_vm6 = vmor %vm49_vm5, %vm51_vm4 }
  0x88   :  { %v2938_v27 = vsel %vm53_vm6, 1.0, %v3889_v24 }
  0x89   :  { %3230 = vmatmul.mubr.msk.f32.vlgmr.msra.gmra.mrb[0].mxu1 %vm66_vm2, %v2938_v27 }
  0x8a   :  { %3510 = vmatpush3.bf16.msra.mxu1 %v3507_v44 }
  0x8b   :  { %3512 = vmatprep.subr.bf16.mxu1 %v3511_v47 }
  0x8e   :  { %3514 = vmatpush3.bf16.msra.mxu1 %v3511_v47 }
 0x15c   :  { %v3997_v28 = vpop.f32.mrb[0].mxu1 }
 0x15d   :  { %v3999_v29 = vpop.f32.mrb[1].mxu1  ;;  %v168_v31 = vsel %vm164_vm7, %v3997_v28, 0.0 }
 0x15e   :  { %v165_v30 = vsel %vm164_vm7, %v3999_v29, 0.0 }
 0x15f   :  { %166 = vadd.xlane.f32.xlu1 %v165_v30 }
 0x163   :  { %169 = vadd.xlane.f32.xlu1 %v168_v31 }
 0x1ec   :  { %v167_v32 = vpop.xlane.xlu1 %166 }
 0x1ed   :  { %v172_v33 = vmul.f32 0.03125, %v167_v32 }
 0x1ef   :  { %v174_v34 = vsub.f32 %v3999_v29, %v172_v33 }
 0x1f0   :  { %v170_v35 = vpop.xlane.xlu1 %169 }
 0x1f1   :  { %v173_v36 = vmul.f32 0.03125, %v170_v35  ;;  %v176_v37 = vmul.f32 %v174_v34, %v174_v34 }
 0x1f3   :  { %v175_v38 = vsub.f32 %v3997_v28, %v173_v36  ;;  %v178_v39 = vsel %vm164_vm7, %v176_v37, 0.0 }
 0x1f4   :  { %179 = vadd.xlane.f32.xlu0 %v178_v39 }
 0x1f5   :  { %v177_v40 = vmul.f32 %v175_v38, %v175_v38 }
 0x1f7   :  { %v181_v41 = vsel %vm164_vm7, %v177_v40, 0.0 }
 0x1f8   :  { %182 = vadd.xlane.f32.xlu1 %v181_v41 }
 0x281   :  { %v180_v48 = vpop.xlane.xlu0 %179 }
 0x282   :  { %v184_v49 = vmul.f32 0.03125, %v180_v48 }
 0x284   :  { %v186_v50 = vadd.f32 1e-05, %v184_v49 }
 0x285   :  { %v183_v51 = vpop.xlane.xlu1 %182 }
 0x286   :  { %3804 = vrsqrt.f32 %v186_v50  ;;  %v185_v52 = vmul.f32 0.03125, %v183_v51 }
 0x288   :  { %v187_v53 = vadd.f32 1e-05, %v185_v52 }
 0x28a   :  { %3806 = vrsqrt.f32 %v187_v53 }
 0x290   :  { %v3805_v54 = vpop.eup %3804 }
 0x291   :  { %v190_v56 = vmul.f32 %v3805_v54, %v174_v34 }
 0x293   :  { %v196_v58 = vmul.f32 %v2941_v55, %v190_v56 }
 0x294   :  { %v3807_v59 = vpop.eup %3806 }
 0x295   :  { %v191_v60 = vmul.f32 %v3807_v59, %v175_v38  ;;  %v202_v61 = vadd.f32 %v2942_v57, %v196_v58 }
 0x297   :  { %v197_v62 = vmul.f32 %v2941_v55, %v191_v60  ;;  %3240 = vmatprep.mubr.msk.f32.mxu1 %vm164_vm7, %v202_v61 }
 0x299   :  { %v203_v63 = vadd.f32 %v2942_v57, %v197_v62 }
 0x29b   :  { %3241 = vmatmul.mubr.msk.f32.vlgmr.msra.gmra.mrb[2].mxu1 %vm164_vm7, %v203_v63 }
 0x36e   :  { %v4029_v0 = vpop.f32.mrb[2].mxu1 }
 0x36f   :  { %v280_v1 = vpop.f32.mrb[3].mxu1 }
 0x370   :  { %3247 = vmatprep.mubr.msk.f32.mxu1 %vm295_vm8, %v280_v1  ;;  %v4033_v2 = vpack.i.bf16 %v4029_v0, %v280_v1 }
 0x372   :  { %3725 = vrot.lane.b32.xlu1 %v4033_v2, %s3890_s18 }
 0x376   :  { %3730 = vrot.lane.b32.xlu1 %v4033_v2, %s3891_s19 }
 0x37a   :  { %499 = vrot.lane.b32.xlu1 %v280_v1, %s3892_s20 }
 0x37e   :  { %501 = vrot.lane.b32.xlu1 %v4029_v0, %s3892_s20 }
 0x3e4   :  { %v3726_v3 = vpop.permute.xlu1 %3725 }
 0x3e5   :  { %v3728_v4 = vunpack.i.h.bf16 %v3726_v3  ;;  %v3727_v5 = vunpack.i.l.bf16 %v3726_v3 }
 0x3e7   :  { %v3515_v7 = vpack.c.bf16 %v3728_v4, %v3727_v5 }
 0x3e8   :  { %v3731_v8 = vpop.permute.xlu1 %3730 }
 0x3e9   :  { %v3733_v9 = vunpack.i.h.bf16 %v3731_v8  ;;  %v3732_v10 = vunpack.i.l.bf16 %v3731_v8  ;;  %3517 = vmatprep.subr.msk.bf16.mxu1 %vm4044_vm9, %v3515_v7 }
 0x3ea   :  { %3520 = vmatpush3.bf16.xpose.msk.msra.mxu1 %vm4044_vm9, %v3515_v7 }
 0x3eb   :  { %v3525_v11 = vpack.c.bf16 %v3733_v9, %v3732_v10 }
 0x3ec   :  { %v500_v12 = vpop.permute.xlu1 %499 }
 0x3ed   :  { %3527 = vmatprep.subr.msk.bf16.mxu1 %vm4044_vm9, %v3525_v11 }
 0x3f0   :  { %v502_v13 = vpop.permute.xlu1 %501 }
 0x3f1   :  { %3248 = vmatmul.mubr.msk.f32.vlgmr.msra.gmra.mrb[4].mxu1 %vm295_vm8, %v4029_v0 }
 0x3f2   :  { %3530 = vmatpush3.bf16.xpose.msk.msra.mxu1 %vm4044_vm9, %v3525_v11  ;;  %3261 = vmatprep.mubr.msk.f32.mxu1 %vm295_vm8, %v500_v12 }
 0x3f9   :  { %3262 = vmatmul.mubr.msk.f32.vlgmr.msra.gmra.mrb[6].mxu1 %vm295_vm8, %v502_v13 }
 0x4c4   :  { %v3249_v21 = vpop.f32.mrb[4].mxu1 }
 0x4c5   :  { %v380_v22 = vmul.f32 0.35355338, %v3249_v21  ;;  %v370_v23 = vpop.f32.mrb[5].mxu1 }
 0x4c6   :  { %v379_v25 = vmul.f32 0.35355338, %v370_v23 }
 0x4c7   :  { %v382_v18 = vsel %vm4067_vm14, %v380_v22, -1e+30 }
 0x4c8   :  { %v387_v26 = vsel %vm383_vm15, %v382_v18, -inf  ;;  %v381_v16 = vsel %vm4071_vm0, %v379_v25, -1e+30 }
 0x4c9   :  { %388 = vmax.xlane.f32.xlu1 %v387_v26  ;;  %v384_v19 = vsel %vm383_vm15, %v381_v16, -inf }
 0x4ca   :  { %385 = vmax.xlane.f32.xlu0 %v384_v19 }
 0x4cc   :  { %v3263_v27 = vpop.f32.mrb[6].mxu1 }
 0x4cd   :  { %v581_v30 = vpop.f32.mrb[7].mxu1  ;;  %v591_v31 = vmul.f32 0.35355338, %v3263_v27 }
 0x4ce   :  { %v590_v32 = vmul.f32 0.35355338, %v581_v30 }
 0x4cf   :  { %v593_v35 = vsel %vm4067_vm14, %v591_v31, -1e+30 }
 0x4d0   :  { %v592_v33 = vsel %vm4071_vm0, %v590_v32, -1e+30  ;;  %v597_v36 = vsel %vm383_vm15, %v593_v35, -inf }
 0x4d1   :  { %v594_v34 = vsel %vm383_vm15, %v592_v33, -inf }
 0x4d2   :  { %595 = vmax.xlane.f32.xlu0 %v594_v34 }
 0x4d6   :  { %598 = vmax.xlane.f32.xlu0 %v597_v36 }
 0x4da   :  { %3740 = vrot.lane.b32.xlu1 %v4033_v2, %s3893_s21 }
 0x4de   :  { %710 = vrot.lane.b32.xlu1 %v280_v1, %s3894_s22 }
 0x4e2   :  { %921 = vrot.lane.b32.xlu1 %v280_v1, %s3895_s23 }
 0x4ec   :  { %3735 = vrot.lane.b32.xlu0 %v4033_v2, %s3896_s24 }
 0x4f0   :  { %3745 = vrot.lane.b32.xlu0 %v4033_v2, %s3897_s25 }
 0x556   :  { %v389_v37 = vpop.xlane.xlu1 %388 }
 0x557   :  { %v391_v38 = vsub.f32 %v382_v18, %v389_v37  ;;  %v386_v39 = vpop.xlane.xlu0 %385 }
 0x558   :  { %v390_v40 = vsub.f32 %v381_v16, %v386_v39 }
 0x559   :  { %v394_v41 = vmul.f32 1.442695, %v391_v38 }
 0x55a   :  { %v392_v42 = vmul.f32 1.442695, %v390_v40  ;;  %v3741_v43 = vpop.permute.xlu1 %3740 }
 0x55b   :  { %3808 = vpow2.f32 %v394_v41  ;;  %v3743_v55 = vunpack.i.h.bf16 %v3741_v43  ;;  %v3742_v57 = vunpack.i.l.bf16 %v3741_v43 }
 0x55c   :  { %3810 = vpow2.f32 %v392_v42 }
 0x55d   :  { %v3531_v62 = vpack.c.bf16 %v3743_v55, %v3742_v57 }
 0x55e   :  { %v4095_v44 = vpop.permute.xlu1 %710 }
 0x55f   :  { %v596_v45 = vpop.xlane.xlu0 %595 }
 0x560   :  { %v600_v46 = vsub.f32 %v592_v33, %v596_v45 }
 0x562   :  { %v922_v47 = vpop.permute.xlu1 %921  ;;  %v602_v51 = vmul.f32 1.442695, %v600_v46 }
 0x563   :  { %3289 = vmatprep.mubr.msk.f32.mxu1 %vm295_vm8, %v922_v47  ;;  %v599_v48 = vpop.xlane.xlu0 %598 }
 0x564   :  { %v601_v49 = vsub.f32 %v593_v35, %v599_v48 }
 0x565   :  { %v3809_v50 = vpop.eup %3808 }
 0x566   :  { %v604_v52 = vmul.f32 1.442695, %v601_v49  ;;  %v399_v53 = vsel %vm383_vm15, %v3809_v50, 0.0  ;;  %v3811_v54 = vpop.eup %3810 }
 0x567   :  { %400 = vadd.xlane.f32.xlu0 %v399_v53  ;;  %v3736_v56 = vpop.permute.xlu0 %3735  ;;  %v396_v60 = vsel %vm383_vm15, %v3811_v54, 0.0 }
 0x568   :  { %3812 = vpow2.f32 %v604_v52  ;;  %v3738_v58 = vunpack.i.h.bf16 %v3736_v56  ;;  %v3737_v59 = vunpack.i.l.bf16 %v3736_v56 }
 0x569   :  { %3814 = vpow2.f32 %v602_v51 }
 0x56a   :  { %v3521_v61 = vpack.c.bf16 %v3738_v58, %v3737_v59 }
 0x56b   :  { %397 = vadd.xlane.f32.xlu0 %v396_v60  ;;  %v3746_v5 = vpop.permute.xlu0 %3745 }
 0x56c   :  { %3522 = vmatprep.subr.bf16.mxu0 %v3521_v61  ;;  %v3748_v12 = vunpack.i.h.bf16 %v3746_v5  ;;  %v3747_v13 = vunpack.i.l.bf16 %v3746_v5 }
 0x56d   :  { %3524 = vmatpush3.bf16.msra.mxu0 %v3521_v61 }
 0x56e   :  { %3532 = vmatprep.subr.bf16.mxu0 %v3531_v62 }
 0x572   :  { %v3813_v63 = vpop.eup %3812 }
 0x573   :  { %v609_v1 = vsel %vm383_vm15, %v3813_v63, 0.0  ;;  %v3815_v3 = vpop.eup %3814 }
 0x574   :  { %610 = vadd.xlane.f32.xlu0 %v609_v1  ;;  %v606_v4 = vsel %vm383_vm15, %v3815_v3, 0.0 }
 0x578   :  { %607 = vadd.xlane.f32.xlu0 %v606_v4 }
 0x58e   :  { %3750 = vrot.lane.b32.xlu0 %v4033_v2, %s3898_s26 }
 0x592   :  { %712 = vrot.lane.b32.xlu0 %v4029_v0, %s3894_s22 }
 0x596   :  { %923 = vrot.lane.b32.xlu0 %v4029_v0, %s3895_s23  ;;  %v3535_v0 = vpack.c.bf16 %v3748_v12, %v3747_v13 }
 0x5f4   :  { %v401_v7 = vpop.xlane.xlu0 %400 }
 0x5f5   :  { %3816 = vrcp.f32 %v401_v7 }
 0x5f8   :  { %v398_v8 = vpop.xlane.xlu0 %397 }
 0x5f9   :  { %3818 = vrcp.f32 %v398_v8 }
 0x5ff   :  { %v3817_v10 = vpop.eup %3816 }
 0x600   :  { %v4108_v17 = vmul.f32 %v3817_v10, %v3809_v50 }
 0x601   :  { %v611_v9 = vpop.xlane.xlu0 %610 }
 0x602   :  { %3820 = vrcp.f32 %v611_v9 }
 0x603   :  { %v3819_v11 = vpop.eup %3818 }
 0x604   :  { %v403_v14 = vmul.f32 %v3819_v11, %v3811_v54 }
 0x605   :  { %v608_v15 = vpop.xlane.xlu0 %607 }
 0x606   :  { %3822 = vrcp.f32 %v608_v15  ;;  %406 = vst.msk [vmem:[%s4687_s9] sm:$0xff] %vm295_vm8, %v403_v14  ;;  %3254 = vmatprep.mubr.msk.f32.mxu0 %vm383_vm15, %v403_v14 }
 0x607   :  { %3255 = vmatmul.mubr.msk.f32.vlgmr.msra.gmra.mrb[0].mxu0 %vm383_vm15, %v4108_v17 }
 0x608   :  { %3534 = vmatpush3.bf16.msra.mxu0 %v3531_v62 }
 0x609   :  { %3537 = vmatprep.subr.msk.bf16.mxu0 %vm4044_vm9, %v3535_v0  ;;  %v3751_v21 = vpop.permute.xlu0 %3750 }
 0x60a   :  { %v3753_v22 = vunpack.i.h.bf16 %v3751_v21  ;;  %v3752_v23 = vunpack.i.l.bf16 %v3751_v21 }
 0x60c   :  { %v3545_v25 = vpack.c.bf16 %v3753_v22, %v3752_v23  ;;  %v3821_v18 = vpop.eup %3820 }
 0x60d   :  { %v713_v26 = vpop.permute.xlu0 %712  ;;  %v4123_v27 = vmul.f32 %v3821_v18, %v3813_v63 }
 0x60e   :  { %3547 = vmatprep.subr.msk.bf16.mxu1 %vm4044_vm9, %v3545_v25 }
 0x60f   :  { %3550 = vmatpush3.bf16.xpose.msk.msra.mxu1 %vm4044_vm9, %v3545_v25 }
 0x610   :  { %v3823_v16 = vpop.eup %3822 }
 0x611   :  { %v613_v19 = vmul.f32 %v3823_v16, %v3815_v3  ;;  %v924_v30 = vpop.permute.xlu0 %923 }
 0x613   :  { %2956 = vst.msk [vmem:[%s4687_s9 + $0x8] sm:$0xff] %vm295_vm8, %v613_v19  ;;  %3268 = vmatprep.mubr.msk.f32.mxu0 %vm383_vm15, %v613_v19 }
 0x614   :  { %3269 = vmatmul.mubr.msk.f32.vlgmr.msra.gmra.mrb[2].mxu0 %vm383_vm15, %v4123_v27 }
 0x615   :  { %3540 = vmatpush3.bf16.xpose.msk.msra.mxu0 %vm4044_vm9, %v3535_v0  ;;  %3275 = vmatprep.mubr.msk.f32.mxu0 %vm295_vm8, %v4095_v44 }
 0x616   :  { %3290 = vmatmul.mubr.msk.f32.vlgmr.msra.gmra.mrb[8].mxu1 %vm295_vm8, %v924_v30 }
 0x61c   :  { %3276 = vmatmul.mubr.msk.f32.vlgmr.msra.gmra.mrb[4].mxu0 %vm295_vm8, %v713_v26 }
 0x6da   :  { %v4138_v31 = vpop.f32.mrb[0].mxu0 }
 0x6db   :  { %v4140_v32 = vpop.f32.mrb[1].mxu0 }
 0x6e7   :  { %v3270_v33 = vpop.f32.mrb[2].mxu0 }
 0x6e8   :  { %v701_v34 = vpop.f32.mrb[3].mxu0 }
 0x6e9   :  { %v3291_v35 = vpop.f32.mrb[8].mxu1 }
 0x6ea   :  { %v1003_v36 = vpop.f32.mrb[9].mxu1  ;;  %v1013_v41 = vmul.f32 0.35355338, %v3291_v35 }
 0x6eb   :  { %v1012_v38 = vmul.f32 0.35355338, %v1003_v36  ;;  %v1163_v36 = vld [vmem:[%s4688_s4] sm:$0xff] }
 0x6ec   :  { %v1015_v48 = vsel %vm4067_vm14, %v1013_v41, -1e+30 }
 0x6ed   :  { %v1014_v47 = vsel %vm4071_vm0, %v1012_v38, -1e+30  ;;  %v1019_v50 = vsel %vm383_vm15, %v1015_v48, -inf }
 0x6ee   :  { %v1016_v49 = vsel %vm383_vm15, %v1014_v47, -inf }
 0x6ef   :  { %v3277_v37 = vpop.f32.mrb[4].mxu0 }
 0x6f0   :  { %v802_v39 = vmul.f32 0.35355338, %v3277_v37  ;;  %v792_v40 = vpop.f32.mrb[5].mxu0  ;;  %v1164_v37 = vld [vmem:[%s4688_s4 + $0x8] sm:$0xff] }
 0x6f1   :  { %v801_v42 = vmul.f32 0.35355338, %v792_v40  ;;  %v3555_v38 = vpack.c.bf16 %v1164_v37, %v1163_v36  ;;  %v1166_v40 = vld [vmem:[%s4688_s4 + $0x18] sm:$0xff] }
 0x6f2   :  { %v804_v43 = vsel %vm4067_vm14, %v802_v39, -1e+30  ;;  %v1165_v39 = vld [vmem:[%s4688_s4 + $0x10] sm:$0xff]  ;;  %v1392_v36 = vld [vmem:[%s4690_s6 + $0x38] sm:$0xff] }
 0x6f3   :  { %v808_v44 = vsel %vm383_vm15, %v804_v43, -inf  ;;  %v803_v45 = vsel %vm4071_vm0, %v801_v42, -1e+30  ;;  %v3559_v41 = vpack.c.bf16 %v1166_v40, %v1165_v39  ;;  %v1394_v39 = vld [vmem:[%s4690_s6 + $0x48] sm:$0xff] }
 0x6f4   :  { %809 = vmax.xlane.f32.xlu0 %v808_v44  ;;  %v805_v46 = vsel %vm383_vm15, %v803_v45, -inf }
 0x6f5   :  { %806 = vmax.xlane.f32.xlu1 %v805_v46 }
 0x6f8   :  { %1017 = vmax.xlane.f32.xlu0 %v1016_v49 }
 0x6f9   :  { %1020 = vmax.xlane.f32.xlu1 %v1019_v50 }
 0x781   :  { %v810_v51 = vpop.xlane.xlu0 %809 }
 0x782   :  { %v807_v52 = vpop.xlane.xlu1 %806  ;;  %v812_v54 = vsub.f32 %v804_v43, %v810_v51 }
 0x783   :  { %v811_v53 = vsub.f32 %v803_v45, %v807_v52 }
 0x784   :  { %v815_v61 = vmul.f32 1.442695, %v812_v54 }
 0x785   :  { %v1018_v55 = vpop.xlane.xlu0 %1017  ;;  %v813_v59 = vmul.f32 1.442695, %v811_v53 }
 0x786   :  { %v1022_v56 = vsub.f32 %v1014_v47, %v1018_v55  ;;  %v1021_v57 = vpop.xlane.xlu1 %1020 }
 0x787   :  { %v1023_v58 = vsub.f32 %v1015_v48, %v1021_v57 }
 0x788   :  { %v1024_v60 = vmul.f32 1.442695, %v1022_v56 }
 0x789   :  { %v1026_v62 = vmul.f32 1.442695, %v1023_v58 }
 0x78a   :  { %3824 = vpow2.f32 %v1024_v60 }
 0x78b   :  { %3826 = vpow2.f32 %v1026_v62 }
 0x78c   :  { %3828 = vpow2.f32 %v813_v59 }
 0x78d   :  { %3830 = vpow2.f32 %v815_v61 }
 0x794   :  { %v3825_v63 = vpop.eup %3824 }
 0x795   :  { %v3827_v1 = vpop.eup %3826  ;;  %v1028_v3 = vsel %vm383_vm15, %v3825_v63, 0.0 }
 0x796   :  { %v3829_v4 = vpop.eup %3828  ;;  %1029 = vadd.xlane.f32.xlu0 %v1028_v3  ;;  %v1031_v5 = vsel %vm383_vm15, %v3827_v1, 0.0 }
 0x797   :  { %v3831_v7 = vpop.eup %3830  ;;  %1032 = vadd.xlane.f32.xlu1 %v1031_v5  ;;  %v817_v8 = vsel %vm383_vm15, %v3829_v4, 0.0 }
 0x798   :  { %v820_v9 = vsel %vm383_vm15, %v3831_v7, 0.0 }
 0x79a   :  { %818 = vadd.xlane.f32.xlu0 %v817_v8 }
 0x79b   :  { %821 = vadd.xlane.f32.xlu1 %v820_v9 }
 0x7ac   :  { %3760 = vrot.lane.b32.xlu1 %v4033_v2, %s3899_s29 }
 0x7b0   :  { %3755 = vrot.lane.b32.xlu0 %v4033_v2, %s3900_s30  ;;  %1134 = vrot.lane.b32.xlu1 %v701_v34, %s3901_s10 }
 0x7b4   :  { %1136 = vrot.lane.b32.xlu0 %v3270_v33, %s3901_s10 }
 0x823   :  { %v1030_v10 = vpop.xlane.xlu0 %1029 }
 0x824   :  { %3832 = vrcp.f32 %v1030_v10  ;;  %v1033_v11 = vpop.xlane.xlu1 %1032 }
 0x827   :  { %v819_v12 = vpop.xlane.xlu0 %818 }
 0x828   :  { %3834 = vrcp.f32 %v819_v12  ;;  %v822_v13 = vpop.xlane.xlu1 %821  ;;  %v1294_v12 = vld [vmem:[%s4689_s5] sm:$0xff] }
 0x829   :  { %3836 = vrcp.f32 %v822_v13  ;;  %v1295_v13 = vld [vmem:[%s4689_s5 + $0x8] sm:$0xff] }
 0x82a   :  { %3838 = vrcp.f32 %v1033_v11 }
 0x82b   :  { %v3756_v14 = vpop.permute.xlu0 %3755 }
 0x82c   :  { %v3758_v15 = vunpack.i.h.bf16 %v3756_v14  ;;  %v3757_v0 = vunpack.i.l.bf16 %v3756_v14  ;;  %v3761_v21 = vpop.permute.xlu1 %3760  ;;  %v3563_v14 = vpack.c.bf16 %v1295_v13, %v1294_v12 }
 0x82d   :  { %v3763_v22 = vunpack.i.h.bf16 %v3761_v21  ;;  %v3762_v23 = vunpack.i.l.bf16 %v3761_v21 }
 0x82e   :  { %v3833_v2 = vpop.eup %3832  ;;  %v3541_v25 = vpack.c.bf16 %v3758_v15, %v3757_v0  ;;  %v1296_v15 = vld [vmem:[%s4689_s5 + $0x10] sm:$0xff]  ;;  %v1297_v0 = vld [vmem:[%s4689_s5 + $0x18] sm:$0xff]  ;;  %3564 = vmatprep.subr.bf16.mxu1 %v3563_v14 }
 0x82f   :  { %v3551_v18 = vpack.c.bf16 %v3763_v22, %v3762_v23  ;;  %v1035_v26 = vmul.f32 %v3833_v2, %v3825_v63  ;;  %v1137_v46 = vpop.permute.xlu0 %1136  ;;  %v3567_v21 = vpack.c.bf16 %v1297_v0, %v1296_v15  ;;  %3566 = vmatpush3.bf16.msra.mxu1 %v3563_v14  ;;  %v1385_v22 = vld [vmem:[%s4690_s6] sm:$0xff]  ;;  %v1386_v23 = vld [vmem:[%s4690_s6 + $0x8] sm:$0xff]  ;;  %v1387_v2 = vld [vmem:[%s4690_s6 + $0x10] sm:$0xff] }
 0x830   :  { %3542 = vmatprep.subr.bf16.mxu0 %v3541_v25  ;;  %v1135_v47 = vpop.permute.xlu1 %1134  ;;  %v1157_v52 = vsel %vm295_vm8, %v4138_v31, %v1137_v46 }
 0x831   :  { %3544 = vmatpush3.bf16.msra.mxu0 %v3541_v25  ;;  %2972 = vst.msk [vmem:[%s4687_s9 + $0x18] sm:$0xff] %vm295_vm8, %v1035_v26  ;;  %v1156_v50 = vsel %vm295_vm8, %v4140_v32, %v1135_v47  ;;  %v2978_v32 = vld [vmem:[%s4686_s2 + $0x2] ss:$0 sm:$0xff]  ;;  %3568 = vmatprep.subr.bf16.mxu1 %v3567_v21  ;;  %v3571_v25 = vpack.c.bf16 %v1386_v23, %v1385_v22 }
 0x832   :  { %v3835_v16 = vpop.eup %3834  ;;  %3552 = vmatprep.subr.bf16.mxu0 %v3551_v18 }
 0x833   :  { %v3837_v19 = vpop.eup %3836  ;;  %v824_v30 = vmul.f32 %v3835_v16, %v3829_v4  ;;  %3570 = vmatpush3.bf16.msra.mxu1 %v3567_v21  ;;  %v1389_v16 = vld [vmem:[%s4690_s6 + $0x20] sm:$0xff] }
 0x834   :  { %v4168_v33 = vmul.f32 %v3837_v19, %v3831_v7  ;;  %v3839_v34 = vpop.eup %3838  ;;  %v1390_v19 = vld [vmem:[%s4690_s6 + $0x28] sm:$0xff] }
 0x835   :  { %2964 = vst.msk [vmem:[%s4687_s9 + $0x10] sm:$0xff] %vm295_vm8, %v824_v30  ;;  %3282 = vmatprep.mubr.msk.f32.mxu0 %vm383_vm15, %v824_v30  ;;  %v4178_v35 = vmul.f32 %v3839_v34, %v3827_v1  ;;  %v3579_v30 = vpack.c.bf16 %v1390_v19, %v1389_v16  ;;  %v1391_v34 = vld [vmem:[%s4690_s6 + $0x30] sm:$0xff] }
 0x836   :  { %3283 = vmatmul.mubr.msk.f32.vlgmr.msra.gmra.mrb[6].mxu0 %vm383_vm15, %v4168_v33  ;;  %v3583_v37 = vpack.c.bf16 %v1392_v36, %v1391_v34  ;;  %v2987_v34 = vld [vmem:[%s4685_s3 + $0x20] sm:$0xff]  ;;  %v2988_v36 = vld [vmem:[%s4685_s3 + $0x28] sm:$0xff] }
 0x837   :  { %3554 = vmatpush3.bf16.msra.mxu0 %v3551_v18  ;;  %3296 = vmatprep.mubr.msk.f32.mxu0 %vm383_vm15, %v1035_v26  ;;  %v1388_v18 = vld [vmem:[%s4690_s6 + $0x18] sm:$0xff] }
 0x838   :  { %3556 = vmatprep.subr.bf16.mxu0 %v3555_v38  ;;  %v3575_v26 = vpack.c.bf16 %v1388_v18, %v1387_v2 }
 0x83a   :  { %3297 = vmatmul.mubr.msk.f32.vlgmr.msra.gmra.mrb[8].mxu0 %vm383_vm15, %v4178_v35 }
 0x83b   :  { %3558 = vmatpush3.bf16.msra.mxu0 %v3555_v38  ;;  %v1393_v38 = vld [vmem:[%s4690_s6 + $0x40] sm:$0xff] }
 0x83c   :  { %3560 = vmatprep.subr.bf16.mxu0 %v3559_v41  ;;  %v3587_v40 = vpack.c.bf16 %v1394_v39, %v1393_v38  ;;  %v2989_v38 = vld [vmem:[%s4685_s3 + $0x30] sm:$0xff]  ;;  %v2990_v39 = vld [vmem:[%s4685_s3 + $0x38] sm:$0xff] }
 0x83f   :  { %3562 = vmatpush3.bf16.msra.mxu0 %v3559_v41  ;;  %v1395_v41 = vld [vmem:[%s4690_s6 + $0x50] sm:$0xff] }
 0x840   :  { %3572 = vmatprep.subr.bf16.mxu0 %v3571_v25 }
 0x909   :  { %v3284_v42 = vpop.f32.mrb[6].mxu0 }
 0x90a   :  { %1144 = vrot.lane.b32.xlu0 %v3284_v42, %s3902_s12  ;;  %v912_v43 = vpop.f32.mrb[7].mxu0  ;;  %v1396_v42 = vld [vmem:[%s4690_s6 + $0x58] sm:$0xff] }
 0x90b   :  { %1142 = vrot.lane.b32.xlu1 %v912_v43, %s3902_s12  ;;  %v3591_v43 = vpack.c.bf16 %v1396_v42, %v1395_v41 }
 0x90d   :  { %v3298_v44 = vpop.f32.mrb[8].mxu0 }
 0x90e   :  { %1152 = vrot.lane.b32.xlu0 %v3298_v44, %s4693_s13  ;;  %v1123_v45 = vpop.f32.mrb[9].mxu0  ;;  %v1397_v44 = vld [vmem:[%s4690_s6 + $0x60] sm:$0xff] }
 0x90f   :  { %1150 = vrot.lane.b32.xlu1 %v1123_v45, %s4693_s13  ;;  %v1398_v45 = vld [vmem:[%s4690_s6 + $0x68] sm:$0xff] }
 0x910   :  { %v3595_v46 = vpack.c.bf16 %v1398_v45, %v1397_v44 }
 0x97c   :  { %v1145_v48 = vpop.permute.xlu0 %1144 }
 0x97d   :  { %v1143_v49 = vpop.permute.xlu1 %1142  ;;  %v1159_v55 = vsel %vm383_vm15, %v1157_v52, %v1145_v48 }
 0x97e   :  { %v1158_v53 = vsel %vm383_vm15, %v1156_v50, %v1143_v49 }
 0x980   :  { %v1153_v51 = vpop.permute.xlu0 %1152 }
 0x981   :  { %v1151_v54 = vpop.permute.xlu1 %1150  ;;  %v1162_v57 = vsel %vm1160_vm1, %v1159_v55, %v1153_v51 }
 0x982   :  { %v1161_v56 = vsel %vm1160_vm1, %v1158_v53, %v1151_v54  ;;  %v2979_v54 = vld [vmem:[%s4686_s2 + $0x3] ss:$0 sm:$0xff] }
 0x983   :  { %3307 = vmatprep.mubr.msk.f32.mxu0 %vm164_vm7, %v1161_v56 }
 0x984   :  { %3308 = vmatmul.mubr.msk.f32.vlgmr.msra.gmra.mrb[10].mxu0 %vm164_vm7, %v1162_v57 }
 0x985   :  { %3574 = vmatpush3.bf16.msra.mxu0 %v3571_v25 }
 0x986   :  { %3576 = vmatprep.subr.bf16.mxu0 %v3575_v26 }
 0x989   :  { %3578 = vmatpush3.bf16.msra.mxu0 %v3575_v26 }
 0x98a   :  { %3580 = vmatprep.subr.bf16.mxu0 %v3579_v30 }
 0x98d   :  { %3582 = vmatpush3.bf16.msra.mxu0 %v3579_v30 }
 0x98e   :  { %3584 = vmatprep.subr.bf16.mxu0 %v3583_v37 }
 0x991   :  { %3586 = vmatpush3.bf16.msra.mxu0 %v3583_v37  ;;  %v3603_v37 = vpack.c.bf16 %v2988_v36, %v2987_v34 }
 0x992   :  { %3588 = vmatprep.subr.bf16.mxu0 %v3587_v40 }
 0x993   :  { %3604 = vmatprep.subr.bf16.mxu1 %v3603_v37 }
 0x995   :  { %3590 = vmatpush3.bf16.msra.mxu0 %v3587_v40  ;;  %v3607_v40 = vpack.c.bf16 %v2990_v39, %v2989_v38 }
 0x996   :  { %3592 = vmatprep.subr.bf16.mxu0 %v3591_v43 }
 0x999   :  { %3594 = vmatpush3.bf16.msra.mxu0 %v3591_v43 }
 0x99a   :  { %3596 = vmatprep.subr.bf16.mxu0 %v3595_v46 }
 0x99d   :  { %3598 = vmatpush3.bf16.msra.mxu0 %v3595_v46 }
 0xa57   :  { %v3309_v58 = vpop.f32.mrb[10].mxu0 }
 0xa58   :  { %v1249_v31 = vadd.f32 %v3309_v58, %v3997_v28  ;;  %v1239_v59 = vpop.f32.mrb[11].mxu0 }
 0xa59   :  { %v1248_v60 = vadd.f32 %v1239_v59, %v3999_v29 }
 0xa5a   :  { %v4213_v61 = vadd.f32 %v2978_v32, %v1249_v31 }
 0xa5b   :  { %v4215_v62 = vadd.f32 %v2978_v32, %v1248_v60  ;;  %v2980_v32 = vld [vmem:[%s4686_s2 + $0x4] ss:$0 sm:$0xff] }
 0xa5c   :  { %v1259_v63 = vsel %vm164_vm7, %v4213_v61, 0.0 }
 0xa5d   :  { %1260 = vadd.xlane.f32.xlu0 %v1259_v63  ;;  %v1256_v1 = vsel %vm164_vm7, %v4215_v62, 0.0  ;;  %v1399_v63 = vld [vmem:[%s4690_s6 + $0x70] sm:$0xff] }
 0xa5e   :  { %1257 = vadd.xlane.f32.xlu1 %v1256_v1  ;;  %v1400_v1 = vld [vmem:[%s4690_s6 + $0x78] sm:$0xff] }
 0xaea   :  { %v1261_v3 = vpop.xlane.xlu0 %1260 }
 0xaeb   :  { %v1263_v4 = vmul.f32 0.03125, %v1261_v3  ;;  %v1258_v5 = vpop.xlane.xlu1 %1257  ;;  %v3599_v3 = vpack.c.bf16 %v1400_v1, %v1399_v63 }
 0xaec   :  { %v1262_v7 = vmul.f32 0.03125, %v1258_v5 }
 0xaed   :  { %v4222_v28 = vsub.f32 %v4213_v61, %v1263_v4  ;;  %3600 = vmatprep.subr.bf16.mxu0 %v3599_v3  ;;  %v2981_v4 = vld [vmem:[%s4686_s2 + $0xc] ss:$0 sm:$0xff] }
 0xaee   :  { %v4225_v29 = vsub.f32 %v4215_v62, %v1262_v7  ;;  %3602 = vmatpush3.bf16.msra.mxu0 %v3599_v3 }
 0xaef   :  { %v1267_v8 = vmul.f32 %v4222_v28, %v4222_v28 }
 0xaf0   :  { %v1266_v9 = vmul.f32 %v4225_v29, %v4225_v29 }
 0xaf1   :  { %v1271_v10 = vsel %vm164_vm7, %v1267_v8, 0.0 }
 0xaf2   :  { %1272 = vadd.xlane.f32.xlu1 %v1271_v10  ;;  %v1268_v11 = vsel %vm164_vm7, %v1266_v9, 0.0  ;;  %v2984_v10 = vld [vmem:[%s4686_s2 + $0x5] ss:$0 sm:$0xff] }
 0xaf3   :  { %1269 = vadd.xlane.f32.xlu0 %v1268_v11 }
 0xb7f   :  { %v1273_v47 = vpop.xlane.xlu1 %1272 }
 0xb80   :  { %v1275_v48 = vmul.f32 0.03125, %v1273_v47  ;;  %v1270_v49 = vpop.xlane.xlu0 %1269 }
 0xb81   :  { %v1274_v50 = vmul.f32 0.03125, %v1270_v49 }
 0xb82   :  { %v1277_v51 = vadd.f32 1e-05, %v1275_v48  ;;  %v2985_v48 = vld [vmem:[%s4686_s2 + $0x6] ss:$0 sm:$0xff] }
 0xb83   :  { %v1276_v52 = vadd.f32 1e-05, %v1274_v50 }
 0xb84   :  { %3840 = vrsqrt.f32 %v1277_v51 }
 0xb85   :  { %3842 = vrsqrt.f32 %v1276_v52  ;;  %v2986_v52 = vld [vmem:[%s4686_s2 + $0x7] ss:$0 sm:$0xff] }
 0xb8e   :  { %v3841_v53 = vpop.eup %3840 }
 0xb8f   :  { %v3843_v55 = vpop.eup %3842  ;;  %v1281_v56 = vmul.f32 %v3841_v53, %v4222_v28 }
 0xb90   :  { %v1280_v57 = vmul.f32 %v3843_v55, %v4225_v29 }
 0xb91   :  { %v1287_v58 = vmul.f32 %v2979_v54, %v1281_v56 }
 0xb92   :  { %v1286_v31 = vmul.f32 %v2979_v54, %v1280_v57 }
 0xb93   :  { %v1293_v60 = vadd.f32 %v2980_v32, %v1287_v58 }
 0xb94   :  { %v1292_v59 = vadd.f32 %v2980_v32, %v1286_v31 }
 0xb96   :  { %3318 = vmatprep.mubr.msk.f32.mxu1 %vm164_vm7, %v1292_v59 }
 0xb97   :  { %3319 = vmatmul.mubr.msk.f32.vlgmr.msra.gmra.mrb[10].mxu1 %vm164_vm7, %v1293_v60 }
 0xb98   :  { %3606 = vmatpush3.bf16.msra.mxu1 %v3603_v37 }
 0xb99   :  { %3608 = vmatprep.subr.bf16.mxu1 %v3607_v40 }
 0xb9c   :  { %3610 = vmatpush3.bf16.msra.mxu1 %v3607_v40 }
 0xc6a   :  { %v3320_v5 = vpop.f32.mrb[10].mxu1 }
 0xc6b   :  { %v1380_v7 = vadd.f32 %v3320_v5, %v2981_v4  ;;  %v1374_v28 = vpop.f32.mrb[11].mxu1 }
 0xc6c   :  { %v1375_v29 = vadd.f32 %v2981_v4, %v1374_v28 }
 0xc6d   :  { %v1384_v9 = vmax.f32 %v1380_v7, 0.0 }
 0xc6e   :  { %v1383_v8 = vmax.f32 %v1375_v29, 0.0 }
 0xc70   :  { %3353 = vmatprep.mubr.f32.mxu0 %v1383_v8 }
 0xc71   :  { %3354 = vmatmul.mubr.f32.vlgmr.msra.gmra.mrb[12].mxu0 %v1384_v9 }
 0xd44   :  { %v3355_v11 = vpop.f32.mrb[12].mxu0 }
 0xd45   :  { %v1477_v12 = vadd.f32 %v3355_v11, %v4213_v61  ;;  %v1467_v13 = vpop.f32.mrb[13].mxu0 }
 0xd46   :  { %v1476_v14 = vadd.f32 %v1467_v13, %v4215_v62 }
 0xd47   :  { %v4311_v15 = vadd.f32 %v2984_v10, %v1477_v12 }
 0xd48   :  { %v4313_v0 = vadd.f32 %v2984_v10, %v1476_v14 }
 0xd49   :  { %v1494_v21 = vsel %vm164_vm7, %v4311_v15, 0.0 }
 0xd4a   :  { %1495 = vadd.xlane.f32.xlu1 %v1494_v21  ;;  %v1491_v22 = vsel %vm164_vm7, %v4313_v0, 0.0 }
 0xd4b   :  { %1492 = vadd.xlane.f32.xlu0 %v1491_v22 }
 0xdd7   :  { %v1496_v23 = vpop.xlane.xlu1 %1495 }
 0xdd8   :  { %v1498_v2 = vmul.f32 0.03125, %v1496_v23  ;;  %v1493_v25 = vpop.xlane.xlu0 %1492 }
 0xdd9   :  { %v1497_v18 = vmul.f32 0.03125, %v1493_v25 }
 0xdda   :  { %v1500_v61 = vsub.f32 %v4311_v15, %v1498_v2 }
 0xddb   :  { %v1499_v62 = vsub.f32 %v4313_v0, %v1497_v18 }
 0xddc   :  { %v1502_v26 = vmul.f32 %v1500_v61, %v1500_v61 }
 0xddd   :  { %v1501_v16 = vmul.f32 %v1499_v62, %v1499_v62 }
 0xdde   :  { %v1506_v19 = vsel %vm164_vm7, %v1502_v26, 0.0 }
 0xddf   :  { %1507 = vadd.xlane.f32.xlu1 %v1506_v19  ;;  %v1503_v30 = vsel %vm164_vm7, %v1501_v16, 0.0 }
 0xde0   :  { %1504 = vadd.xlane.f32.xlu0 %v1503_v30 }
 0xe6c   :  { %v1508_v41 = vpop.xlane.xlu1 %1507 }
 0xe6d   :  { %v1510_v42 = vmul.f32 0.03125, %v1508_v41  ;;  %v1505_v43 = vpop.xlane.xlu0 %1504 }
 0xe6e   :  { %v1509_v44 = vmul.f32 0.03125, %v1505_v43 }
 0xe6f   :  { %v1512_v45 = vadd.f32 1e-05, %v1510_v42 }
 0xe70   :  { %v1511_v46 = vadd.f32 1e-05, %v1509_v44 }
 0xe71   :  { %3844 = vrsqrt.f32 %v1512_v45 }
 0xe72   :  { %3846 = vrsqrt.f32 %v1511_v46 }
 0xe7b   :  { %v3845_v47 = vpop.eup %3844 }
 0xe7c   :  { %v3847_v49 = vpop.eup %3846  ;;  %v1516_v50 = vmul.f32 %v3845_v47, %v1500_v61 }
 0xe7d   :  { %v1515_v51 = vmul.f32 %v3847_v49, %v1499_v62 }
 0xe7e   :  { %v1522_v53 = vmul.f32 %v2985_v48, %v1516_v50 }
 0xe7f   :  { %v1521_v54 = vmul.f32 %v2985_v48, %v1515_v51 }
 0xe80   :  { %v1528_v56 = vadd.f32 %v2986_v52, %v1522_v53 }
 0xe81   :  { %v1527_v55 = vadd.f32 %v2986_v52, %v1521_v54 }
 0xe83   :  { %3364 = vmatprep.mubr.msk.f32.mxu1 %vm164_vm7, %v1527_v55 }
 0xe84   :  { %3365 = vmatmul.mubr.msk.f32.vlgmr.msra.gmra.mrb[12].mxu1 %vm164_vm7, %v1528_v56 }
 0xf57   :  { %v4343_v57 = vpop.f32.mrb[12].mxu1 }
 0xf58   :  { %v4345_v32 = vpop.f32.mrb[13].mxu1 }
 0xf59   :  { %3371 = vmatprep.mubr.msk.f32.mxu1 %vm295_vm8, %v4345_v32  ;;  %v4351_v58 = vpack.i.bf16 %v4343_v57, %v4345_v32 }
 0xf5b   :  { %3765 = vrot.lane.b32.xlu0 %v4351_v58, %s3890_s18 }
 0xf5f   :  { %3775 = vrot.lane.b32.xlu0 %v4351_v58, %s3891_s19 }
 0xf63   :  { %1824 = vrot.lane.b32.xlu0 %v4345_v32, %s3892_s20 }
 0xf67   :  { %3780 = vrot.lane.b32.xlu0 %v4351_v58, %s3897_s25 }
 0xf6b   :  { %1826 = vrot.lane.b32.xlu0 %v4343_v57, %s3892_s20 }
 0xf6f   :  { %2037 = vrot.lane.b32.xlu0 %v4343_v57, %s3894_s22 }
 0xfcd   :  { %v3766_v31 = vpop.permute.xlu0 %3765 }
 0xfce   :  { %v3768_v59 = vunpack.i.h.bf16 %v3766_v31  ;;  %v3767_v60 = vunpack.i.l.bf16 %v3766_v31 }
 0xfd0   :  { %v3611_v63 = vpack.c.bf16 %v3768_v59, %v3767_v60 }
 0xfd1   :  { %v3776_v1 = vpop.permute.xlu0 %3775 }
 0xfd2   :  { %3613 = vmatprep.subr.msk.bf16.mxu1 %vm4044_vm9, %v3611_v63  ;;  %v3778_v37 = vunpack.i.h.bf16 %v3776_v1  ;;  %v3777_v38 = vunpack.i.l.bf16 %v3776_v1 }
 0xfd3   :  { %3616 = vmatpush3.bf16.xpose.msk.msra.mxu1 %vm4044_vm9, %v3611_v63 }
 0xfd4   :  { %v3621_v43 = vpack.c.bf16 %v3778_v37, %v3777_v38 }
 0xfd5   :  { %v1825_v3 = vpop.permute.xlu0 %1824 }
 0xfd9   :  { %v3781_v4 = vpop.permute.xlu0 %3780 }
 0xfda   :  { %v3783_v5 = vunpack.i.h.bf16 %v3781_v4  ;;  %v3782_v7 = vunpack.i.l.bf16 %v3781_v4  ;;  %3372 = vmatmul.mubr.msk.f32.vlgmr.msra.gmra.mrb[14].mxu1 %vm295_vm8, %v4343_v57 }
 0xfdc   :  { %v3631_v28 = vpack.c.bf16 %v3783_v5, %v3782_v7 }
 0xfdd   :  { %v1827_v34 = vpop.permute.xlu0 %1826 }
 0xfde   :  { %3633 = vmatprep.subr.msk.bf16.mxu0 %vm4044_vm9, %v3631_v28 }
 0xfdf   :  { %3636 = vmatpush3.bf16.xpose.msk.msra.mxu0 %vm4044_vm9, %v3631_v28 }
 0xfe1   :  { %v2038_v44 = vpop.permute.xlu0 %2037 }
0x10ad   :  { %v3373_v29 = vpop.f32.mrb[14].mxu1 }
0x10ae   :  { %v1695_v8 = vpop.f32.mrb[15].mxu1  ;;  %v1705_v9 = vmul.f32 0.35355338, %v3373_v29 }
0x10af   :  { %v1704_v10 = vmul.f32 0.35355338, %v1695_v8 }
0x10b0   :  { %v1707_v13 = vsel %vm4067_vm14, %v1705_v9, -1e+30 }
0x10b1   :  { %v1706_v11 = vsel %vm4071_vm0, %v1704_v10, -1e+30  ;;  %v1711_v14 = vsel %vm383_vm15, %v1707_v13, -inf }
0x10b2   :  { %v1708_v12 = vsel %vm383_vm15, %v1706_v11, -inf }
0x10b3   :  { %1709 = vmax.xlane.f32.xlu1 %v1708_v12 }
0x10b7   :  { %1712 = vmax.xlane.f32.xlu1 %v1711_v14 }
0x1140   :  { %v1710_v21 = vpop.xlane.xlu1 %1709 }
0x1141   :  { %v1714_v22 = vsub.f32 %v1706_v11, %v1710_v21 }
0x1143   :  { %v1716_v25 = vmul.f32 1.442695, %v1714_v22 }
0x1144   :  { %v1713_v23 = vpop.xlane.xlu1 %1712 }
0x1145   :  { %v1715_v2 = vsub.f32 %v1707_v13, %v1713_v23 }
0x1147   :  { %v1718_v18 = vmul.f32 1.442695, %v1715_v2 }
0x1149   :  { %3848 = vpow2.f32 %v1718_v18 }
0x114a   :  { %3850 = vpow2.f32 %v1716_v25 }
0x1153   :  { %v3849_v61 = vpop.eup %3848 }
0x1154   :  { %v1723_v62 = vsel %vm383_vm15, %v3849_v61, 0.0  ;;  %v3851_v26 = vpop.eup %3850 }
0x1155   :  { %1724 = vadd.xlane.f32.xlu1 %v1723_v62  ;;  %v1720_v16 = vsel %vm383_vm15, %v3851_v26, 0.0 }
0x1159   :  { %1721 = vadd.xlane.f32.xlu1 %v1720_v16 }
0x116a   :  { %3770 = vrot.lane.b32.xlu1 %v4351_v58, %s3896_s24 }
0x116e   :  { %2035 = vrot.lane.b32.xlu1 %v4345_v32, %s3894_s22 }
0x11e2   :  { %v1725_v19 = vpop.xlane.xlu1 %1724 }
0x11e3   :  { %3852 = vrcp.f32 %v1725_v19 }
0x11e6   :  { %v1722_v30 = vpop.xlane.xlu1 %1721 }
0x11e7   :  { %3854 = vrcp.f32 %v1722_v30 }
0x11ea   :  { %v3771_v36 = vpop.permute.xlu1 %3770 }
0x11eb   :  { %v3773_v39 = vunpack.i.h.bf16 %v3771_v36  ;;  %v3772_v40 = vunpack.i.l.bf16 %v3771_v36 }
0x11ed   :  { %v3617_v41 = vpack.c.bf16 %v3773_v39, %v3772_v40  ;;  %v3853_v45 = vpop.eup %3852 }
0x11ee   :  { %v2036_v42 = vpop.permute.xlu1 %2035  ;;  %v4391_v48 = vmul.f32 %v3853_v45, %v3849_v61 }
0x11ef   :  { %3618 = vmatprep.subr.bf16.mxu1 %v3617_v41  ;;  %3399 = vmatprep.mubr.msk.f32.mxu0 %vm295_vm8, %v2036_v42 }
0x11f0   :  { %3620 = vmatpush3.bf16.msra.mxu1 %v3617_v41  ;;  %3400 = vmatmul.mubr.msk.f32.vlgmr.msra.gmra.mrb[14].mxu0 %vm295_vm8, %v2038_v44 }
0x11f1   :  { %v3855_v46 = vpop.eup %3854  ;;  %3623 = vmatprep.subr.msk.bf16.mxu1 %vm4044_vm9, %v3621_v43 }
0x11f2   :  { %v1727_v47 = vmul.f32 %v3855_v46, %v3851_v26 }
0x11f4   :  { %2997 = vst.msk [vmem:[%s4687_s9 + $0x40] sm:$0xff] %vm295_vm8, %v1727_v47  ;;  %3378 = vmatprep.mubr.msk.f32.mxu1 %vm383_vm15, %v1727_v47 }
0x11f5   :  { %3379 = vmatmul.mubr.msk.f32.vlgmr.msra.gmra.mrb[16].mxu1 %vm383_vm15, %v4391_v48 }
0x11f6   :  { %3385 = vmatprep.mubr.msk.f32.mxu1 %vm295_vm8, %v1825_v3 }
0x11f9   :  { %3626 = vmatpush3.bf16.xpose.msk.msra.mxu1 %vm4044_vm9, %v3621_v43 }
0x1200   :  { %3386 = vmatmul.mubr.msk.f32.vlgmr.msra.gmra.mrb[18].mxu1 %vm295_vm8, %v1827_v34 }
0x12c3   :  { %v3401_v49 = vpop.f32.mrb[14].mxu0 }
0x12c4   :  { %v2117_v50 = vpop.f32.mrb[15].mxu0  ;;  %v2127_v31 = vmul.f32 0.35355338, %v3401_v49 }
0x12c5   :  { %v2126_v54 = vmul.f32 0.35355338, %v2117_v50 }
0x12c6   :  { %v2129_v5 = vsel %vm4067_vm14, %v2127_v31, -1e+30 }
0x12c7   :  { %v2128_v4 = vsel %vm4071_vm0, %v2126_v54, -1e+30  ;;  %v2133_v28 = vsel %vm383_vm15, %v2129_v5, -inf }
0x12c8   :  { %v4404_v51 = vpop.f32.mrb[16].mxu1  ;;  %v2130_v7 = vsel %vm383_vm15, %v2128_v4, -inf }
0x12c9   :  { %v4406_v52 = vpop.f32.mrb[17].mxu1 }
0x12d3   :  { %v3387_v53 = vpop.f32.mrb[18].mxu1 }
0x12d4   :  { %v1916_v55 = vmul.f32 0.35355338, %v3387_v53  ;;  %v1906_v56 = vpop.f32.mrb[19].mxu1 }
0x12d5   :  { %v1915_v59 = vmul.f32 0.35355338, %v1906_v56 }
0x12d6   :  { %v1918_v60 = vsel %vm4067_vm14, %v1916_v55, -1e+30 }
0x12d7   :  { %v1922_v63 = vsel %vm383_vm15, %v1918_v60, -inf  ;;  %v1917_v1 = vsel %vm4071_vm0, %v1915_v59, -1e+30 }
0x12d8   :  { %1923 = vmax.xlane.f32.xlu0 %v1922_v63  ;;  %v1919_v3 = vsel %vm383_vm15, %v1917_v1, -inf }
0x12d9   :  { %1920 = vmax.xlane.f32.xlu1 %v1919_v3 }
0x12dc   :  { %2131 = vmax.xlane.f32.xlu0 %v2130_v7 }
0x12dd   :  { %2134 = vmax.xlane.f32.xlu1 %v2133_v28 }
0x1365   :  { %v1924_v29 = vpop.xlane.xlu0 %1923 }
0x1366   :  { %v1921_v8 = vpop.xlane.xlu1 %1920  ;;  %v1926_v10 = vsub.f32 %v1918_v60, %v1924_v29 }
0x1367   :  { %v1925_v9 = vsub.f32 %v1917_v1, %v1921_v8 }
0x1368   :  { %v1929_v23 = vmul.f32 1.442695, %v1926_v10 }
0x1369   :  { %v2132_v11 = vpop.xlane.xlu0 %2131  ;;  %v1927_v21 = vmul.f32 1.442695, %v1925_v9 }
0x136a   :  { %v2136_v12 = vsub.f32 %v2128_v4, %v2132_v11  ;;  %v2135_v13 = vpop.xlane.xlu1 %2134 }
0x136b   :  { %v2137_v14 = vsub.f32 %v2129_v5, %v2135_v13 }
0x136c   :  { %v2138_v22 = vmul.f32 1.442695, %v2136_v12 }
0x136d   :  { %v2140_v2 = vmul.f32 1.442695, %v2137_v14 }
0x136e   :  { %3856 = vpow2.f32 %v2138_v22 }
0x136f   :  { %3858 = vpow2.f32 %v2140_v2 }
0x1370   :  { %3860 = vpow2.f32 %v1927_v21 }
0x1371   :  { %3862 = vpow2.f32 %v1929_v23 }
0x1378   :  { %v3857_v25 = vpop.eup %3856 }
0x1379   :  { %v3859_v18 = vpop.eup %3858  ;;  %v2142_v61 = vsel %vm383_vm15, %v3857_v25, 0.0 }
0x137a   :  { %v3861_v62 = vpop.eup %3860  ;;  %2143 = vadd.xlane.f32.xlu0 %v2142_v61  ;;  %v2145_v26 = vsel %vm383_vm15, %v3859_v18, 0.0 }
0x137b   :  { %v3863_v16 = vpop.eup %3862  ;;  %2146 = vadd.xlane.f32.xlu1 %v2145_v26  ;;  %v1931_v19 = vsel %vm383_vm15, %v3861_v62, 0.0 }
0x137c   :  { %v1934_v30 = vsel %vm383_vm15, %v3863_v16, 0.0 }
0x137e   :  { %1932 = vadd.xlane.f32.xlu0 %v1931_v19 }
0x137f   :  { %1935 = vadd.xlane.f32.xlu1 %v1934_v30 }
0x1390   :  { %3790 = vrot.lane.b32.xlu1 %v4351_v58, %s3900_s30 }
0x1394   :  { %3785 = vrot.lane.b32.xlu0 %v4351_v58, %s3893_s21  ;;  %3795 = vrot.lane.b32.xlu1 %v4351_v58, %s3898_s26 }
0x1398   :  { %2246 = vrot.lane.b32.xlu0 %v4345_v32, %s3895_s23  ;;  %2248 = vrot.lane.b32.xlu1 %v4343_v57, %s3895_s23 }
0x1407   :  { %v2144_v34 = vpop.xlane.xlu0 %2143 }
0x1408   :  { %3864 = vrcp.f32 %v2144_v34  ;;  %v2147_v36 = vpop.xlane.xlu1 %2146 }
0x140b   :  { %v1933_v37 = vpop.xlane.xlu0 %1932 }
0x140c   :  { %3866 = vrcp.f32 %v1933_v37  ;;  %v1936_v38 = vpop.xlane.xlu1 %1935 }
0x140d   :  { %3868 = vrcp.f32 %v1936_v38  ;;  %v3025_v38 = vld [vmem:[%s4688_s4 + $0x20] sm:$0xff] }
0x140e   :  { %3870 = vrcp.f32 %v2147_v36 }
0x140f   :  { %v3786_v39 = vpop.permute.xlu0 %3785 }
0x1410   :  { %v3788_v40 = vunpack.i.h.bf16 %v3786_v39  ;;  %v3787_v41 = vunpack.i.l.bf16 %v3786_v39  ;;  %v3791_v42 = vpop.permute.xlu1 %3790  ;;  %v3026_v39 = vld [vmem:[%s4688_s4 + $0x28] sm:$0xff] }
0x1411   :  { %v3793_v43 = vunpack.i.h.bf16 %v3791_v42  ;;  %v3792_v44 = vunpack.i.l.bf16 %v3791_v42  ;;  %v3028_v42 = vld [vmem:[%s4688_s4 + $0x38] sm:$0xff] }
0x1412   :  { %v3865_v45 = vpop.eup %3864  ;;  %v3627_v46 = vpack.c.bf16 %v3788_v40, %v3787_v41  ;;  %v3027_v40 = vld [vmem:[%s4688_s4 + $0x30] sm:$0xff]  ;;  %v3651_v41 = vpack.c.bf16 %v3026_v39, %v3025_v38  ;;  %v3049_v39 = vld [vmem:[%s4690_s6 + $0xc0] sm:$0xff] }
0x1413   :  { %v3637_v32 = vpack.c.bf16 %v3793_v43, %v3792_v44  ;;  %v2149_v47 = vmul.f32 %v3865_v45, %v3857_v25  ;;  %v2247_v63 = vpop.permute.xlu0 %2246  ;;  %v3655_v43 = vpack.c.bf16 %v3028_v42, %v3027_v40  ;;  %v3050_v40 = vld [vmem:[%s4690_s6 + $0xc8] sm:$0xff]  ;;  %v3051_v42 = vld [vmem:[%s4690_s6 + $0xd0] sm:$0xff] }
0x1414   :  { %3628 = vmatprep.subr.bf16.mxu1 %v3627_v46  ;;  %v3796_v57 = vpop.permute.xlu1 %3795 }
0x1415   :  { %3630 = vmatpush3.bf16.msra.mxu1 %v3627_v46  ;;  %3013 = vst.msk [vmem:[%s4687_s9 + $0x50] sm:$0xff] %vm295_vm8, %v2149_v47  ;;  %v3798_v50 = vunpack.i.h.bf16 %v3796_v57  ;;  %v3797_v53 = vunpack.i.l.bf16 %v3796_v57 }
0x1416   :  { %v3867_v49 = vpop.eup %3866  ;;  %3638 = vmatprep.subr.bf16.mxu1 %v3637_v32 }
0x1417   :  { %v3869_v54 = vpop.eup %3868  ;;  %v1938_v55 = vmul.f32 %v3867_v49, %v3861_v62  ;;  %v3641_v59 = vpack.c.bf16 %v3798_v50, %v3797_v53 }
0x1418   :  { %v4438_v56 = vmul.f32 %v3869_v54, %v3863_v16  ;;  %v3871_v31 = vpop.eup %3870  ;;  %v2249_v1 = vpop.permute.xlu1 %2248 }
0x1419   :  { %3005 = vst.msk [vmem:[%s4687_s9 + $0x48] sm:$0xff] %vm295_vm8, %v1938_v55  ;;  %3392 = vmatprep.mubr.msk.f32.mxu1 %vm383_vm15, %v1938_v55  ;;  %v4448_v60 = vmul.f32 %v3871_v31, %v3859_v18 }
0x141a   :  { %3393 = vmatmul.mubr.msk.f32.vlgmr.msra.gmra.mrb[20].mxu1 %vm383_vm15, %v4438_v56 }
0x141b   :  { %3640 = vmatpush3.bf16.msra.mxu1 %v3637_v32  ;;  %3406 = vmatprep.mubr.msk.f32.mxu1 %vm383_vm15, %v2149_v47 }
0x141c   :  { %3643 = vmatprep.subr.msk.bf16.mxu1 %vm4044_vm9, %v3641_v59 }
0x141e   :  { %3407 = vmatmul.mubr.msk.f32.vlgmr.msra.gmra.mrb[22].mxu1 %vm383_vm15, %v4448_v60 }
0x141f   :  { %3413 = vmatprep.mubr.msk.f32.mxu1 %vm295_vm8, %v2247_v63 }
0x1424   :  { %3646 = vmatpush3.bf16.xpose.msk.msra.mxu1 %vm4044_vm9, %v3641_v59 }
0x142b   :  { %3414 = vmatmul.mubr.msk.f32.vlgmr.msra.gmra.mrb[24].mxu1 %vm295_vm8, %v2249_v1 }
0x14ed   :  { %v3394_v3 = vpop.f32.mrb[20].mxu1 }
0x14ee   :  { %v2026_v4 = vpop.f32.mrb[21].mxu1 }
0x14f1   :  { %v3408_v5 = vpop.f32.mrb[22].mxu1 }
0x14f2   :  { %v2237_v7 = vpop.f32.mrb[23].mxu1 }
0x14fe   :  { %v3415_v28 = vpop.f32.mrb[24].mxu1 }
0x14ff   :  { %v2338_v29 = vmul.f32 0.35355338, %v3415_v28  ;;  %v2328_v8 = vpop.f32.mrb[25].mxu1 }
0x1500   :  { %v2337_v9 = vmul.f32 0.35355338, %v2328_v8 }
0x1501   :  { %v2340_v10 = vsel %vm4067_vm14, %v2338_v29, -1e+30 }
0x1502   :  { %v2344_v11 = vsel %vm383_vm15, %v2340_v10, -inf  ;;  %v2339_v6 = vsel %vm4071_vm0, %v2337_v9, -1e+30 }
0x1503   :  { %2345 = vmax.xlane.f32.xlu1 %v2344_v11  ;;  %v2341_v12 = vsel %vm383_vm15, %v2339_v6, -inf }
0x1504   :  { %2342 = vmax.xlane.f32.xlu0 %v2341_v12 }
0x1514   :  { %3800 = vrot.lane.b32.xlu1 %v4351_v58, %s3899_s29 }
0x1518   :  { %2461 = vrot.lane.b32.xlu1 %v3394_v3, %s3901_s10 }
0x151c   :  { %2467 = vrot.lane.b32.xlu1 %v2237_v7, %s3902_s12 }
0x1590   :  { %v2346_v13 = vpop.xlane.xlu1 %2345 }
0x1591   :  { %v2348_v14 = vsub.f32 %v2340_v10, %v2346_v13  ;;  %v2343_v20 = vpop.xlane.xlu0 %2342 }
0x1592   :  { %v2347_v21 = vsub.f32 %v2339_v6, %v2343_v20  ;;  %v3034_v20 = vld [vmem:[%s4689_s5 + $0x20] sm:$0xff] }
0x1593   :  { %v2351_v22 = vmul.f32 1.442695, %v2348_v14 }
0x1594   :  { %v2349_v23 = vmul.f32 1.442695, %v2347_v21  ;;  %v3801_v2 = vpop.permute.xlu1 %3800  ;;  %v3035_v21 = vld [vmem:[%s4689_s5 + $0x28] sm:$0xff] }
0x1595   :  { %v3803_v24 = vunpack.i.h.bf16 %v3801_v2  ;;  %v3802_v25 = vunpack.i.l.bf16 %v3801_v2  ;;  %v3037_v2 = vld [vmem:[%s4689_s5 + $0x38] sm:$0xff] }
0x1596   :  { %3872 = vpow2.f32 %v2349_v23  ;;  %v3036_v23 = vld [vmem:[%s4689_s5 + $0x30] sm:$0xff] }
0x1597   :  { %v3647_v18 = vpack.c.bf16 %v3803_v24, %v3802_v25  ;;  %3874 = vpow2.f32 %v2351_v22  ;;  %v3659_v22 = vpack.c.bf16 %v3035_v21, %v3034_v20  ;;  %v3663_v24 = vpack.c.bf16 %v3037_v2, %v3036_v23  ;;  %v3041_v25 = vld [vmem:[%s4690_s6 + $0x80] sm:$0xff]  ;;  %v3057_v20 = vld [vmem:[%s4686_s2 + $0xb] ss:$0 sm:$0xff] }
0x1598   :  { %v2462_v32 = vpop.permute.xlu1 %2461 }
0x1599   :  { %3648 = vmatprep.subr.bf16.mxu0 %v3647_v18  ;;  %v2482_v53 = vsel %vm295_vm8, %v4404_v51, %v2462_v32  ;;  %3660 = vmatprep.subr.bf16.mxu1 %v3659_v22 }
0x159a   :  { %3650 = vmatpush3.bf16.msra.mxu0 %v3647_v18  ;;  %3662 = vmatpush3.bf16.msra.mxu1 %v3659_v22  ;;  %v3042_v18 = vld [vmem:[%s4690_s6 + $0x88] sm:$0xff] }
0x159b   :  { %3652 = vmatprep.subr.bf16.mxu0 %v3651_v41  ;;  %3664 = vmatprep.subr.bf16.mxu1 %v3663_v24 }
0x159c   :  { %v2468_v57 = vpop.permute.xlu1 %2467 }
0x159e   :  { %3666 = vmatpush3.bf16.msra.mxu1 %v3663_v24 }
0x15a0   :  { %v3873_v61 = vpop.eup %3872 }
0x15a1   :  { %v2353_v58 = vsel %vm383_vm15, %v3873_v61, 0.0  ;;  %v3875_v62 = vpop.eup %3874 }
0x15a2   :  { %2354 = vadd.xlane.f32.xlu0 %v2353_v58  ;;  %v2356_v26 = vsel %vm383_vm15, %v3875_v62, 0.0  ;;  %v3667_v58 = vpack.c.bf16 %v3042_v18, %v3041_v25 }
0x15a6   :  { %2357 = vadd.xlane.f32.xlu0 %v2356_v26 }
0x15bc   :  { %2459 = vrot.lane.b32.xlu0 %v2026_v4, %s3901_s10 }
0x15c0   :  { %2469 = vrot.lane.b32.xlu0 %v3408_v5, %s3902_s12 }
0x162f   :  { %v2355_v16 = vpop.xlane.xlu0 %2354 }
0x1630   :  { %3876 = vrcp.f32 %v2355_v16  ;;  %v3045_v16 = vld [vmem:[%s4690_s6 + $0xa0] sm:$0xff] }
0x1633   :  { %v2358_v19 = vpop.xlane.xlu0 %2357 }
0x1634   :  { %3878 = vrcp.f32 %v2358_v19  ;;  %v3046_v19 = vld [vmem:[%s4690_s6 + $0xa8] sm:$0xff] }
0x1637   :  { %v2460_v46 = vpop.permute.xlu0 %2459 }
0x1638   :  { %v2481_v49 = vsel %vm295_vm8, %v4406_v52, %v2460_v46  ;;  %v3031_v52 = vld [vmem:[%s4686_s2 + $0x8] ss:$0 sm:$0xff] }
0x1639   :  { %v2483_v55 = vsel %vm383_vm15, %v2481_v49, %v2468_v57  ;;  %v3054_v46 = vld [vmem:[%s4690_s6 + $0xe8] sm:$0xff] }
0x163a   :  { %v3877_v30 = vpop.eup %3876 }
0x163b   :  { %v2360_v34 = vmul.f32 %v3877_v30, %v3873_v61  ;;  %v2470_v47 = vpop.permute.xlu0 %2469  ;;  %v3043_v61 = vld [vmem:[%s4690_s6 + $0x90] sm:$0xff]  ;;  %v3675_v30 = vpack.c.bf16 %v3046_v19, %v3045_v16 }
0x163c   :  { %v2484_v31 = vsel %vm383_vm15, %v2482_v53, %v2470_v47 }
0x163d   :  { %3021 = vst.msk [vmem:[%s4687_s9 + $0x58] sm:$0xff] %vm295_vm8, %v2360_v34  ;;  %3420 = vmatprep.mubr.msk.f32.mxu0 %vm383_vm15, %v2360_v34  ;;  %v3047_v34 = vld [vmem:[%s4690_s6 + $0xb0] sm:$0xff] }
0x163e   :  { %v3879_v36 = vpop.eup %3878 }
0x163f   :  { %v4477_v37 = vmul.f32 %v3879_v36, %v3875_v62  ;;  %v3044_v62 = vld [vmem:[%s4690_s6 + $0x98] sm:$0xff] }
0x1640   :  { %v3671_v26 = vpack.c.bf16 %v3044_v62, %v3043_v61  ;;  %v3048_v36 = vld [vmem:[%s4690_s6 + $0xb8] sm:$0xff] }
0x1641   :  { %3421 = vmatmul.mubr.msk.f32.vlgmr.msra.gmra.mrb[16].mxu0 %vm383_vm15, %v4477_v37  ;;  %v3679_v38 = vpack.c.bf16 %v3048_v36, %v3047_v34  ;;  %v2837_v36 = vld [vmem:[%s4691_s7] sm:$0xff] }
0x1642   :  { %3654 = vmatpush3.bf16.msra.mxu0 %v3651_v41  ;;  %v3683_v41 = vpack.c.bf16 %v3050_v40, %v3049_v39 }
0x1643   :  { %3656 = vmatprep.subr.bf16.mxu0 %v3655_v43 }
0x1646   :  { %3658 = vmatpush3.bf16.msra.mxu0 %v3655_v43  ;;  %v3052_v43 = vld [vmem:[%s4690_s6 + $0xd8] sm:$0xff] }
0x1647   :  { %3668 = vmatprep.subr.bf16.mxu0 %v3667_v58 }
0x1714   :  { %v3422_v44 = vpop.f32.mrb[16].mxu0 }
0x1715   :  { %2477 = vrot.lane.b32.xlu0 %v3422_v44, %s4701_s1  ;;  %v2448_v45 = vpop.f32.mrb[17].mxu0  ;;  %v3687_v44 = vpack.c.bf16 %v3052_v43, %v3051_v42 }
0x1716   :  { %2475 = vrot.lane.b32.xlu1 %v2448_v45, %s4701_s1  ;;  %v3053_v45 = vld [vmem:[%s4690_s6 + $0xe0] sm:$0xff] }
0x1717   :  { %v3691_v32 = vpack.c.bf16 %v3054_v46, %v3053_v45 }
0x1787   :  { %v2478_v50 = vpop.permute.xlu0 %2477 }
0x1788   :  { %v2476_v54 = vpop.permute.xlu1 %2475  ;;  %v2486_v63 = vsel %vm1160_vm1, %v2484_v31, %v2478_v50  ;;  %v3032_v31 = vld [vmem:[%s4686_s2 + $0x9] ss:$0 sm:$0xff] }
0x1789   :  { %v2485_v59 = vsel %vm1160_vm1, %v2483_v55, %v2476_v54 }
0x178a   :  { %3431 = vmatprep.mubr.msk.f32.mxu0 %vm164_vm7, %v2485_v59 }
0x178b   :  { %3432 = vmatmul.mubr.msk.f32.vlgmr.msra.gmra.mrb[18].mxu0 %vm164_vm7, %v2486_v63 }
0x178c   :  { %3670 = vmatpush3.bf16.msra.mxu0 %v3667_v58 }
0x178d   :  { %3672 = vmatprep.subr.bf16.mxu0 %v3671_v26 }
0x1790   :  { %3674 = vmatpush3.bf16.msra.mxu0 %v3671_v26 }
0x1791   :  { %3676 = vmatprep.subr.bf16.mxu0 %v3675_v30 }
0x1794   :  { %3678 = vmatpush3.bf16.msra.mxu0 %v3675_v30 }
0x1795   :  { %3680 = vmatprep.subr.bf16.mxu0 %v3679_v38 }
0x1798   :  { %3682 = vmatpush3.bf16.msra.mxu0 %v3679_v38  ;;  %v2838_v38 = vld [vmem:[%s4691_s7 + $0x8] sm:$0xff] }
0x1799   :  { %3684 = vmatprep.subr.bf16.mxu0 %v3683_v41  ;;  %v3699_v39 = vpack.c.bf16 %v2838_v38, %v2837_v36 }
0x179b   :  { %3700 = vmatprep.subr.bf16.mxu1 %v3699_v39 }
0x179c   :  { %3686 = vmatpush3.bf16.msra.mxu0 %v3683_v41 }
0x179d   :  { %3688 = vmatprep.subr.bf16.mxu0 %v3687_v44 }
0x17a0   :  { %3690 = vmatpush3.bf16.msra.mxu0 %v3687_v44 }
0x17a1   :  { %3692 = vmatprep.subr.bf16.mxu0 %v3691_v32 }
0x17a4   :  { %3694 = vmatpush3.bf16.msra.mxu0 %v3691_v32 }
0x185e   :  { %v3433_v1 = vpop.f32.mrb[18].mxu0 }
0x185f   :  { %v2574_v51 = vadd.f32 %v3433_v1, %v4311_v15  ;;  %v2564_v3 = vpop.f32.mrb[19].mxu0  ;;  %v3033_v1 = vld [vmem:[%s4686_s2 + $0xa] ss:$0 sm:$0xff] }
0x1860   :  { %v2573_v4 = vadd.f32 %v2564_v3, %v4313_v0 }
0x1861   :  { %v4510_v5 = vadd.f32 %v3031_v52, %v2574_v51 }
0x1862   :  { %v4512_v7 = vadd.f32 %v3031_v52, %v2573_v4 }
0x1863   :  { %v2584_v28 = vsel %vm164_vm7, %v4510_v5, 0.0 }
0x1864   :  { %2585 = vadd.xlane.f32.xlu0 %v2584_v28  ;;  %v2581_v29 = vsel %vm164_vm7, %v4512_v7, 0.0 }
0x1865   :  { %2582 = vadd.xlane.f32.xlu1 %v2581_v29  ;;  %v3055_v29 = vld [vmem:[%s4690_s6 + $0xf0] sm:$0xff] }
0x18f1   :  { %v2586_v8 = vpop.xlane.xlu0 %2585 }
0x18f2   :  { %v2588_v9 = vmul.f32 0.03125, %v2586_v8  ;;  %v2583_v10 = vpop.xlane.xlu1 %2582  ;;  %v3056_v8 = vld [vmem:[%s4690_s6 + $0xf8] sm:$0xff] }
0x18f3   :  { %v2587_v11 = vmul.f32 0.03125, %v2583_v10  ;;  %v3038_v10 = vld [vmem:[%s4686_s2 + $0xd] ss:$0 sm:$0xff] }
0x18f4   :  { %v4519_v15 = vsub.f32 %v4510_v5, %v2588_v9  ;;  %v3695_v9 = vpack.c.bf16 %v3056_v8, %v3055_v29 }
0x18f5   :  { %v4522_v0 = vsub.f32 %v4512_v7, %v2587_v11 }
0x18f6   :  { %v2592_v6 = vmul.f32 %v4519_v15, %v4519_v15  ;;  %3696 = vmatprep.subr.bf16.mxu0 %v3695_v9 }
0x18f7   :  { %v2591_v12 = vmul.f32 %v4522_v0, %v4522_v0  ;;  %3698 = vmatpush3.bf16.msra.mxu0 %v3695_v9 }
0x18f8   :  { %v2596_v13 = vsel %vm164_vm7, %v2592_v6, 0.0 }
0x18f9   :  { %2597 = vadd.xlane.f32.xlu1 %v2596_v13  ;;  %v2593_v14 = vsel %vm164_vm7, %v2591_v12, 0.0 }
0x18fa   :  { %2594 = vadd.xlane.f32.xlu0 %v2593_v14 }
0x1986   :  { %v2598_v47 = vpop.xlane.xlu1 %2597 }
0x1987   :  { %v2600_v57 = vmul.f32 0.03125, %v2598_v47  ;;  %v2595_v49 = vpop.xlane.xlu0 %2594 }
0x1988   :  { %v2599_v50 = vmul.f32 0.03125, %v2595_v49 }
0x1989   :  { %v2602_v53 = vadd.f32 1e-05, %v2600_v57 }
0x198a   :  { %v2601_v54 = vadd.f32 1e-05, %v2599_v50 }
0x198b   :  { %3880 = vrsqrt.f32 %v2602_v53 }
0x198c   :  { %3882 = vrsqrt.f32 %v2601_v54  ;;  %v3058_v54 = vld [vmem:[%s4686_s2 + $0xe] ss:$0 sm:$0xff] }
0x1995   :  { %v3881_v55 = vpop.eup %3880 }
0x1996   :  { %v3883_v59 = vpop.eup %3882  ;;  %v2606_v63 = vmul.f32 %v3881_v55, %v4519_v15 }
0x1997   :  { %v2605_v52 = vmul.f32 %v3883_v59, %v4522_v0 }
0x1998   :  { %v2612_v51 = vmul.f32 %v3032_v31, %v2606_v63 }
0x1999   :  { %v2611_v3 = vmul.f32 %v3032_v31, %v2605_v52 }
0x199a   :  { %v2618_v28 = vadd.f32 %v3033_v1, %v2612_v51 }
0x199b   :  { %v2617_v4 = vadd.f32 %v3033_v1, %v2611_v3 }
0x199d   :  { %3442 = vmatprep.mubr.msk.f32.mxu1 %vm164_vm7, %v2617_v4 }
0x199e   :  { %3443 = vmatmul.mubr.msk.f32.vlgmr.msra.gmra.mrb[26].mxu1 %vm164_vm7, %v2618_v28 }
0x199f   :  { %3702 = vmatpush3.bf16.msra.mxu1 %v3699_v39 }
0x1a71   :  { %v3444_v11 = vpop.f32.mrb[26].mxu1 }
0x1a72   :  { %v2706_v15 = vadd.f32 %v3444_v11, %v3038_v10  ;;  %v2700_v0 = vpop.f32.mrb[27].mxu1 }
0x1a73   :  { %v2701_v6 = vadd.f32 %v3038_v10, %v2700_v0 }
0x1a74   :  { %v2710_v13 = vmax.f32 %v2706_v15, 0.0 }
0x1a75   :  { %v2709_v12 = vmax.f32 %v2701_v6, 0.0 }
0x1a77   :  { %3477 = vmatprep.mubr.f32.mxu0 %v2709_v12 }
0x1a78   :  { %3478 = vmatmul.mubr.f32.vlgmr.msra.gmra.mrb[20].mxu0 %v2710_v13 }
0x1b4b   :  { %v3479_v14 = vpop.f32.mrb[20].mxu0 }
0x1b4c   :  { %v2804_v21 = vadd.f32 %v3479_v14, %v4510_v5  ;;  %v2794_v22 = vpop.f32.mrb[21].mxu0 }
0x1b4d   :  { %v2803_v23 = vadd.f32 %v2794_v22, %v4512_v7 }
0x1b4e   :  { %v2810_v2 = vadd.f32 %v3057_v20, %v2804_v21 }
0x1b4f   :  { %v2809_v24 = vadd.f32 %v3057_v20, %v2803_v23 }
0x1b50   :  { %v2814_v25 = vsel %vm164_vm7, %v2810_v2, 0.0 }
0x1b51   :  { %2815 = vadd.xlane.f32.xlu1 %v2814_v25  ;;  %v2811_v18 = vsel %vm164_vm7, %v2809_v24, 0.0 }
0x1b52   :  { %2812 = vadd.xlane.f32.xlu0 %v2811_v18 }
0x1bde   :  { %v2816_v61 = vpop.xlane.xlu1 %2815 }
0x1bdf   :  { %v2818_v58 = vmul.f32 0.03125, %v2816_v61  ;;  %v2813_v62 = vpop.xlane.xlu0 %2812 }
0x1be0   :  { %v2817_v26 = vmul.f32 0.03125, %v2813_v62 }
0x1be1   :  { %v2820_v16 = vsub.f32 %v2810_v2, %v2818_v58 }
0x1be2   :  { %v2819_v19 = vsub.f32 %v2809_v24, %v2817_v26 }
0x1be3   :  { %v2822_v30 = vmul.f32 %v2820_v16, %v2820_v16 }
0x1be4   :  { %v2821_v34 = vmul.f32 %v2819_v19, %v2819_v19 }
0x1be5   :  { %v2826_v5 = vsel %vm164_vm7, %v2822_v30, 0.0 }
0x1be6   :  { %2827 = vadd.xlane.f32.xlu1 %v2826_v5  ;;  %v2823_v7 = vsel %vm164_vm7, %v2821_v34, 0.0 }
0x1be7   :  { %2824 = vadd.xlane.f32.xlu0 %v2823_v7 }
0x1bf7   :  { %619 = vrot.lane.b32.xlu1 %v4123_v27, %s3892_s20  ;;  %v2839_v27 = vld [vmem:[%s4691_s7 + $0x10] sm:$0xff] }
0x1bfb   :  { %830 = vrot.lane.b32.xlu1 %v4168_v33, %s3892_s20  ;;  %v2840_v33 = vld [vmem:[%s4691_s7 + $0x18] sm:$0xff] }
0x1bfc   :  { %v3703_v40 = vpack.c.bf16 %v2840_v33, %v2839_v27 }
0x1bfd   :  { %408 = vrot.lane.b32.xlu0 %v4108_v17, %s3892_s20 }
0x1bfe   :  { %3704 = vmatprep.subr.bf16.mxu1 %v3703_v40 }
0x1bff   :  { %1733 = vrot.lane.b32.xlu1 %v4391_v48, %s3892_s20  ;;  %3706 = vmatpush3.bf16.msra.mxu1 %v3703_v40 }
0x1c01   :  { %1041 = vrot.lane.b32.xlu0 %v4178_v35, %s3892_s20 }
0x1c03   :  { %2155 = vrot.lane.b32.xlu1 %v4448_v60, %s3892_s20 }
0x1c05   :  { %1944 = vrot.lane.b32.xlu0 %v4438_v56, %s3892_s20 }
0x1c09   :  { %2366 = vrot.lane.b32.xlu0 %v4477_v37, %s3892_s20 }
0x1c73   :  { %v2828_v17 = vpop.xlane.xlu1 %2827 }
0x1c74   :  { %v2830_v48 = vmul.f32 0.03125, %v2828_v17  ;;  %v2825_v41 = vpop.xlane.xlu0 %2824 }
0x1c75   :  { %v2829_v42 = vmul.f32 0.03125, %v2825_v41 }
0x1c76   :  { %v2832_v43 = vadd.f32 1e-05, %v2830_v48 }
0x1c77   :  { %v2831_v44 = vadd.f32 1e-05, %v2829_v42  ;;  %v620_v45 = vpop.permute.xlu1 %619 }
0x1c78   :  { %3884 = vrsqrt.f32 %v2832_v43  ;;  %2957 = vst.msk [vmem:[%s4687_s9 + $0x28] sm:$0xff] %vm295_vm8, %v620_v45  ;;  %v409_v35 = vpop.permute.xlu0 %408 }
0x1c79   :  { %3886 = vrsqrt.f32 %v2831_v44  ;;  %2949 = vst.msk [vmem:[%s4687_s9 + $0x20] sm:$0xff] %vm295_vm8, %v409_v35 }
0x1c7b   :  { %v831_v56 = vpop.permute.xlu1 %830 }
0x1c7c   :  { %2965 = vst.msk [vmem:[%s4687_s9 + $0x30] sm:$0xff] %vm295_vm8, %v831_v56  ;;  %v1042_v60 = vpop.permute.xlu0 %1041 }
0x1c7d   :  { %2973 = vst.msk [vmem:[%s4687_s9 + $0x38] sm:$0xff] %vm295_vm8, %v1042_v60 }
0x1c7f   :  { %v1734_v37 = vpop.permute.xlu1 %1733 }
0x1c80   :  { %2998 = vst.msk [vmem:[%s4687_s9 + $0x60] sm:$0xff] %vm295_vm8, %v1734_v37  ;;  %v1945_v46 = vpop.permute.xlu0 %1944 }
0x1c81   :  { %3006 = vst.msk [vmem:[%s4687_s9 + $0x68] sm:$0xff] %vm295_vm8, %v1945_v46 }
0x1c82   :  { %v3885_v32 = vpop.eup %3884 }
0x1c83   :  { %v3887_v47 = vpop.eup %3886  ;;  %v2156_v57 = vpop.permute.xlu1 %2155  ;;  %v2836_v53 = vmul.f32 %v3885_v32, %v2820_v16 }
0x1c84   :  { %3014 = vst.msk [vmem:[%s4687_s9 + $0x70] sm:$0xff] %vm295_vm8, %v2156_v57  ;;  %v2367_v49 = vpop.permute.xlu0 %2366  ;;  %v2835_v50 = vmul.f32 %v3887_v47, %v2819_v19 }
0x1c85   :  { %3022 = vst.msk [vmem:[%s4687_s9 + $0x78] sm:$0xff] %vm295_vm8, %v2367_v49 }
0x1c86   :  { %3488 = vmatprep.mubr.msk.f32.mxu1 %vm164_vm7, %v2835_v50 }
0x1c87   :  { %3489 = vmatmul.mubr.msk.f32.vlgmr.msra.gmra.mrb[28].mxu1 %vm164_vm7, %v2836_v53 }
0x1d5a   :  { %v3490_v55 = vpop.f32.mrb[28].mxu1 }
0x1d5b   :  { %v2924_v31 = vadd.f32 %v3490_v55, %v3058_v54  ;;  %v2918_v59 = vpop.f32.mrb[29].mxu1 }
0x1d5c   :  { %v2919_v63 = vadd.f32 %v3058_v54, %v2918_v59 }
0x1d5d   :  { %2928 = vst [vmem:[%s4692_s8 + $0x8] sm:$0xff] %v2924_v31 }
0x1d5e   :  { %2927 = vst [vmem:[%s4692_s8] sm:$0xff] %v2919_v63 }

</bundles_post_ra>
